<compile_context>
chip_gen: v5e
topology: v5e:2x2
jax: 0.10.0
libtpu: 0.0.40
codegen_flags: <defaults>
</compile_context>

<pallas_src>
import functools

import jax
import jax.numpy as jnp
from jax.experimental import pallas as pl
from jax.experimental.pallas import tpu as pltpu


# --------------------------------------------------------------------------
# Kernel body
# --------------------------------------------------------------------------
def _skip_linear_kernel(x_ref, wt_ref, b_ref, o_ref, *, in_features, split_write):
    x = x_ref[...]                                    # (TB, IN), input dtype
    w = wt_ref[...]                                   # (IN, OUT), f32 or bf16
    a = x if x.dtype == w.dtype else x.astype(w.dtype)
    # MXU matmul with f32 accumulation; bias add stays in f32.
    y = jnp.dot(a, w, preferred_element_type=jnp.float32) + b_ref[...]
    x32 = x.astype(jnp.float32)
    out_features = y.shape[-1]

    if in_features == out_features:
        # No padding: plain residual add.
        o_ref[...] = (y + x32).astype(o_ref.dtype)
    elif split_write:
        # Lane-aligned split write: skip add only on the first IN columns,
        # plain pass-through of the rest.  No concat, no zero block.
        o_ref[:, :in_features] = (y[:, :in_features] + x32).astype(o_ref.dtype)
        o_ref[:, in_features:] = y[:, in_features:].astype(o_ref.dtype)
    else:
        # Correctness fallback (only reachable with un-prepared, non-aligned
        # weights) — materializes a (TB, OUT) temporary; slower.
        pad = jnp.zeros((x32.shape[0], out_features - in_features), jnp.float32)
        o_ref[...] = (y + jnp.concatenate([x32, pad], axis=-1)).astype(o_ref.dtype)


# --------------------------------------------------------------------------
# One-time parameter preparation (hoisted out of the per-call path)
# --------------------------------------------------------------------------
def _round_up(x, m):
    return -(-x // m) * m


def prepare_skip_linear_params(weight, bias, *, mxu_dtype=jnp.float32):
    """weight: (OUT, IN) nn.Linear layout; bias: (OUT,).

    Returns (wt, b2): wt = weight.T in `mxu_dtype` (use jnp.bfloat16 on
    v6e/v7x when the precision budget allows — note the activation operand of
    the matmul is then also cast to bf16), b2 = bias as (1, OUT) f32.
    If in_features is not lane-aligned, the contraction dim is zero-padded up
    to the lane width (never past OUT) so the kernel keeps its fast
    split-write path; this is numerically identical.
    """
    out_features, in_features = weight.shape
    assert out_features >= in_features, "skip connection needs OUT >= IN"
    wt = jnp.asarray(weight).T.astype(mxu_dtype)          # (IN, OUT)
    if in_features < out_features and in_features % 128 != 0:
        k_pad = min(_round_up(in_features, 128), out_features)
        wt = jnp.pad(wt, ((0, k_pad - in_features), (0, 0)))
    b2 = jnp.asarray(bias).reshape(1, out_features).astype(jnp.float32)
    return wt, b2


# --------------------------------------------------------------------------
# Tiling policy
# --------------------------------------------------------------------------
def _pick_batch_tile(batch, out_features, out_itemsize, min_tile, requested=None,
                     target_out_bytes=3 << 19):
    """Pick the batch (sublane) tile.

    * Big enough that each grid step writes ~1.5 MiB of output (measured HBM
      roofline knee is around 0.5-1 MiB/step; below that the ~0.35 us/step
      pipeline overhead dominates this bandwidth-bound kernel).
    * Multiple of the dtype-aware minimum sublane tile (8 f32/16 bf16/32 i8).
    * Need NOT divide `batch` — the grid uses pl.cdiv and the ragged last
      block is masked (rows are independent).
    * When it costs nothing (per-step output stays >= 512 KiB) nudge the grid
      to an even step count so v7x's two TensorCores stay balanced; on 1-TC
      v5e/v6e this is harmless and the largest tile is kept otherwise.
    """
    if requested is None:
        requested = max(min_tile, target_out_bytes // (out_features * out_itemsize))
    tb = _round_up(max(min_tile, min(requested, batch)), min_tile)
    steps = pl.cdiv(batch, tb)
    if steps % 2 == 1:
        tb_even = _round_up(pl.cdiv(batch, steps + 1), min_tile)
        if tb_even * out_features * out_itemsize >= (1 << 19):
            tb = tb_even
    return tb


# --------------------------------------------------------------------------
# pallas_call builder + wrapper
# --------------------------------------------------------------------------
def _build_skip_linear(B, IN, OUT, tb, out_dtype, split_write, vmem_limit,
                       single_buffer_params):
    kernel = functools.partial(
        _skip_linear_kernel, in_features=IN, split_write=split_write)

    def const_spec(shape):
        # Weight/bias never change across grid steps (index_map == (0,0));
        # single-buffer them to halve their VMEM footprint.
        if single_buffer_params:
            return pl.BlockSpec(shape, lambda i: (0, 0),
                                pipeline_mode=pl.Buffered(1))
        return pl.BlockSpec(shape, lambda i: (0, 0))

    return pl.pallas_call(
        kernel,
        out_shape=jax.ShapeDtypeStruct((B, OUT), out_dtype),
        grid_spec=pltpu.PrefetchScalarGridSpec(
            num_scalar_prefetch=0,
            grid=(pl.cdiv(B, tb),),                      # ragged last block OK
            in_specs=[
                pl.BlockSpec((tb, IN), lambda i: (i, 0)),
                const_spec((IN, OUT)),                   # weight, VMEM resident
                const_spec((1, OUT)),                    # bias, VMEM resident
            ],
            out_specs=pl.BlockSpec((tb, OUT), lambda i: (i, 0)),
        ),
        compiler_params=pltpu.CompilerParams(
            dimension_semantics=("parallel",),           # batch axis -> both TCs
            vmem_limit_bytes=vmem_limit,                 # v5e default is 16 MiB
        ),
    )


def skip_linear(x, wt, b2, *, batch_tile=None, out_dtype=None):
    """x: [B, IN]; wt: [K, OUT] from prepare_skip_linear_params (K >= IN,
    zero-padded); b2: [1, OUT]."""
    B, in_x = x.shape
    K, OUT = wt.shape
    assert K >= in_x, "weight has fewer input features than x"
    assert OUT >= K, "skip connection assumes out_features >= in_features"
    assert b2.shape == (1, OUT)

    if K > in_x:
        # K was zero-padded at prep time; pad x with zero columns to match.
        # Zero columns change neither the matmul nor the skip add.
        x = jnp.pad(x, ((0, 0), (0, K - in_x)))
    IN = K
    out_dtype = x.dtype if out_dtype is None else jnp.dtype(out_dtype)

    x_isz = jnp.dtype(x.dtype).itemsize
    wt_isz = jnp.dtype(wt.dtype).itemsize
    o_isz = jnp.dtype(out_dtype).itemsize
    min_tile = {4: 8, 2: 16, 1: 32}.get(x_isz, 8)        # (8/16/32, 128) packing

    tb = _pick_batch_tile(B, OUT, o_isz, min_tile, batch_tile)
    split_write = (IN % 128 == 0) and (IN < OUT)

    def vmem_bytes(param_bufs):
        return (param_bufs * IN * OUT * wt_isz            # resident weight
                + param_bufs * OUT * 4                    # resident bias
                + 2 * tb * IN * x_isz                     # double-buffered x
                + 2 * tb * OUT * o_isz)                   # double-buffered out

    vmem_est = vmem_bytes(1)
    assert vmem_est <= 28 * 1024 * 1024, (
        f"resident weight + tiles ~{vmem_est / 2**20:.1f} MiB won't fit VMEM; "
        "add a K/N grid axis with a VMEM accumulator for features this large")
    # Explicit scoped-VMEM limit: estimate (worst case: double-buffered
    # params fallback) + ~30% headroom, floored at 24 MiB, capped well under
    # v7x's 64 MiB physical VMEM.
    vmem_limit = int(min(max(vmem_bytes(2) * 1.3 + (2 << 20), 24 << 20), 48 << 20))

    args = (B, IN, OUT, tb, out_dtype, split_write, vmem_limit)
    try:
        return _build_skip_linear(*args, single_buffer_params=True)(x, wt, b2)
    except Exception:
        # Older jax / unsupported pipeline_mode=pl.Buffered(1): fall back to
        # the default double-buffered resident params (correctness identical).
        return _build_skip_linear(*args, single_buffer_params=False)(x, wt, b2)


# --------------------------------------------------------------------------
# Demo / self-test
# --------------------------------------------------------------------------
if __name__ == "__main__":
    # Shapes consistent with the module: Linear(in_features=128, out_features=256).
    B, IN, OUT = 256, 128, 256

    key = jax.random.PRNGKey(0)
    kx, kw, kb = jax.random.split(key, 3)

    x = jax.random.normal(kx, (B, IN), dtype=jnp.float32)
    bound = 1.0 / jnp.sqrt(IN)
    weight = jax.random.uniform(kw, (OUT, IN), jnp.float32, -bound, bound)
    bias = jax.random.uniform(kb, (OUT,), jnp.float32, -bound, bound)

    # Pure-JAX reference of the forward semantics.
    ref = jnp.pad(x, ((0, 0), (0, OUT - IN))) + (x @ weight.T + bias)

    # f32 path (exact-semantics check).
    wt32, b2 = prepare_skip_linear_params(weight, bias, mxu_dtype=jnp.float32)
    out = jax.block_until_ready(skip_linear(x, wt32, b2))
    assert out.shape == (B, OUT)
    assert jnp.allclose(out, ref, atol=1e-5, rtol=1e-5)

    # Bandwidth-optimized path: bf16 activations + bf16 MXU weight (documented
    # precision trade; bias/skip adds still run in f32 inside the kernel).
    wt_bf, _ = prepare_skip_linear_params(weight, bias, mxu_dtype=jnp.bfloat16)
    out_bf = jax.block_until_ready(
        skip_linear(x.astype(jnp.bfloat16), wt_bf, b2, out_dtype=jnp.float32))
    assert jnp.allclose(out_bf, ref, atol=2e-1, rtol=2e-1)

    print("KERNEL_OK")
</pallas_src>

<mosaic_0001>
module attributes {stable_mosaic.version = 11 : i64} {
  func.func @_skip_linear_kernel(%arg0: i32, %arg1: memref<256x128xf32, #tpu.memory_space<vmem>>, %arg2: memref<128x256xf32, #tpu.memory_space<vmem>>, %arg3: memref<1x256xf32, #tpu.memory_space<vmem>>, %arg4: memref<256x256xf32, #tpu.memory_space<vmem>>) attributes {dimension_semantics = [#tpu.dimension_semantics<parallel>], iteration_bounds = array<i64: 1>, scalar_prefetch = 0 : i64, scratch_operands = 0 : i64, tpu.core_type = #tpu.core_type<tc>, window_params = [{transform_indices = @transform_0, window_bounds = array<i64: 256, 128>}, {pipeline_mode = #tpu.pipeline_mode<synchronous>, transform_indices = @transform_1, window_bounds = array<i64: 128, 256>}, {pipeline_mode = #tpu.pipeline_mode<synchronous>, transform_indices = @transform_2, window_bounds = array<i64: 1, 256>}, {transform_indices = @transform_3, window_bounds = array<i64: 256, 256>}]} {
    %c0 = arith.constant 0 : index
    %c0_0 = arith.constant 0 : index
    %0 = vector.load %arg1[%c0, %c0_0] : memref<256x128xf32, #tpu.memory_space<vmem>>, vector<256x128xf32>
    %c0_1 = arith.constant 0 : index
    %c0_2 = arith.constant 0 : index
    %1 = vector.load %arg2[%c0_1, %c0_2] : memref<128x256xf32, #tpu.memory_space<vmem>>, vector<128x256xf32>
    %cst = arith.constant dense<0.000000e+00> : vector<256x256xf32>
    %2 = tpu.matmul %0, %1, %cst {dimension_numbers = #tpu.dot_dimension_numbers<[1], [0], [0], [1], [0, 0, 1, 1], [], []>} : vector<256x128xf32>, vector<128x256xf32>, vector<256x256xf32> -> vector<256x256xf32>
    %c0_3 = arith.constant 0 : index
    %c0_4 = arith.constant 0 : index
    %3 = vector.load %arg3[%c0_3, %c0_4] : memref<1x256xf32, #tpu.memory_space<vmem>>, vector<1x256xf32>
    %4 = vector.broadcast %3 : vector<1x256xf32> to vector<256x256xf32>
    %5 = arith.addf %2, %4 : vector<256x256xf32>
    %6 = vector.extract_strided_slice %5 {offsets = [0, 0], sizes = [256, 128], strides = [1, 1]} : vector<256x256xf32> to vector<256x128xf32>
    %7 = arith.addf %6, %0 : vector<256x128xf32>
    %c0_5 = arith.constant 0 : index
    %c0_6 = arith.constant 0 : index
    %8 = vector.load %arg4[%c0_5, %c0_6] : memref<256x256xf32, #tpu.memory_space<vmem>>, vector<256x128xf32>
    tpu.vector_store %arg4[%c0_5, %c0_6], %7 {strides = array<i32>} : memref<256x256xf32, #tpu.memory_space<vmem>>, vector<256x128xf32>,
    %9 = vector.extract_strided_slice %5 {offsets = [0, 128], sizes = [256, 128], strides = [1, 1]} : vector<256x256xf32> to vector<256x128xf32>
    %c0_7 = arith.constant 0 : index
    %c128 = arith.constant 128 : index
    %10 = vector.load %arg4[%c0_7, %c128] : memref<256x256xf32, #tpu.memory_space<vmem>>, vector<256x128xf32>
    tpu.vector_store %arg4[%c0_7, %c128], %9 {strides = array<i32>} : memref<256x256xf32, #tpu.memory_space<vmem>>, vector<256x128xf32>,
    return
  }
  func.func @transform_0(%arg0: i32) -> (i32, i32) {
    %c0_i32 = arith.constant 0 : i32
    %c0_i32_0 = arith.constant 0 : i32
    return %arg0, %c0_i32 : i32, i32
  }
  func.func @transform_1(%arg0: i32) -> (i32, i32) {
    %c0_i32 = arith.constant 0 : i32
    %c0_i32_0 = arith.constant 0 : i32
    %c0_i32_1 = arith.constant 0 : i32
    return %c0_i32, %c0_i32_0 : i32, i32
  }
  func.func @transform_2(%arg0: i32) -> (i32, i32) {
    %c0_i32 = arith.constant 0 : i32
    %c0_i32_0 = arith.constant 0 : i32
    %c0_i32_1 = arith.constant 0 : i32
    return %c0_i32, %c0_i32_0 : i32, i32
  }
  func.func @transform_3(%arg0: i32) -> (i32, i32) {
    %c0_i32 = arith.constant 0 : i32
    %c0_i32_0 = arith.constant 0 : i32
    return %arg0, %c0_i32 : i32, i32
  }
}

module attributes {stable_mosaic.version = 11 : i64} {
  func.func @_skip_linear_kernel(%arg0: i32, %arg1: memref<256x128xf32, #tpu.memory_space<vmem>>, %arg2: memref<128x256xf32, #tpu.memory_space<vmem>>, %arg3: memref<1x256xf32, #tpu.memory_space<vmem>>, %arg4: memref<256x256xf32, #tpu.memory_space<vmem>>) attributes {dimension_semantics = [#tpu.dimension_semantics<parallel>], iteration_bounds = array<i64: 1>, scalar_prefetch = 0 : i64, scratch_operands = 0 : i64, tpu.core_type = #tpu.core_type<tc>, window_params = [{transform_indices = @transform_0, window_bounds = array<i64: 256, 128>}, {pipeline_mode = #tpu.pipeline_mode<synchronous>, transform_indices = @transform_1, window_bounds = array<i64: 128, 256>}, {pipeline_mode = #tpu.pipeline_mode<synchronous>, transform_indices = @transform_2, window_bounds = array<i64: 1, 256>}, {transform_indices = @transform_3, window_bounds = array<i64: 256, 256>}]} {
    %c0 = arith.constant 0 : index
    %c0_0 = arith.constant 0 : index
    %0 = vector.load %arg1[%c0, %c0_0] : memref<256x128xf32, #tpu.memory_space<vmem>>, vector<256x128xf32>
    %c0_1 = arith.constant 0 : index
    %c0_2 = arith.constant 0 : index
    %1 = vector.load %arg2[%c0_1, %c0_2] : memref<128x256xf32, #tpu.memory_space<vmem>>, vector<128x256xf32>
    %cst = arith.constant dense<0.000000e+00> : vector<256x256xf32>
    %2 = tpu.matmul %0, %1, %cst {dimension_numbers = #tpu.dot_dimension_numbers<[1], [0], [0], [1], [0, 0, 1, 1], [], []>} : vector<256x128xf32>, vector<128x256xf32>, vector<256x256xf32> -> vector<256x256xf32>
    %c0_3 = arith.constant 0 : index
    %c0_4 = arith.constant 0 : index
    %3 = vector.load %arg3[%c0_3, %c0_4] : memref<1x256xf32, #tpu.memory_space<vmem>>, vector<1x256xf32>
    %4 = vector.broadcast %3 : vector<1x256xf32> to vector<256x256xf32>
    %5 = arith.addf %2, %4 : vector<256x256xf32>
    %6 = vector.extract_strided_slice %5 {offsets = [0, 0], sizes = [256, 128], strides = [1, 1]} : vector<256x256xf32> to vector<256x128xf32>
    %7 = arith.addf %6, %0 : vector<256x128xf32>
    %c0_5 = arith.constant 0 : index
    %c0_6 = arith.constant 0 : index
    %8 = vector.load %arg4[%c0_5, %c0_6] : memref<256x256xf32, #tpu.memory_space<vmem>>, vector<256x128xf32>
    tpu.vector_store %arg4[%c0_5, %c0_6], %7 {strides = array<i32>} : memref<256x256xf32, #tpu.memory_space<vmem>>, vector<256x128xf32>,
    %9 = vector.extract_strided_slice %5 {offsets = [0, 128], sizes = [256, 128], strides = [1, 1]} : vector<256x256xf32> to vector<256x128xf32>
    %c0_7 = arith.constant 0 : index
    %c128 = arith.constant 128 : index
    %10 = vector.load %arg4[%c0_7, %c128] : memref<256x256xf32, #tpu.memory_space<vmem>>, vector<256x128xf32>
    tpu.vector_store %arg4[%c0_7, %c128], %9 {strides = array<i32>} : memref<256x256xf32, #tpu.memory_space<vmem>>, vector<256x128xf32>,
    return
  }
  func.func @transform_0(%arg0: i32) -> (i32, i32) {
    %c0_i32 = arith.constant 0 : i32
    %c0_i32_0 = arith.constant 0 : i32
    return %arg0, %c0_i32 : i32, i32
  }
  func.func @transform_1(%arg0: i32) -> (i32, i32) {
    %c0_i32 = arith.constant 0 : i32
    %c0_i32_0 = arith.constant 0 : i32
    %c0_i32_1 = arith.constant 0 : i32
    return %c0_i32, %c0_i32_0 : i32, i32
  }
  func.func @transform_2(%arg0: i32) -> (i32, i32) {
    %c0_i32 = arith.constant 0 : i32
    %c0_i32_0 = arith.constant 0 : i32
    %c0_i32_1 = arith.constant 0 : i32
    return %c0_i32, %c0_i32_0 : i32, i32
  }
  func.func @transform_3(%arg0: i32) -> (i32, i32) {
    %c0_i32 = arith.constant 0 : i32
    %c0_i32_0 = arith.constant 0 : i32
    return %arg0, %c0_i32 : i32, i32
  }
}

</mosaic_0001>

<bundles_post_ra>
// kernel: tpu_custom_call.1
= control target key start
LH: loop header
LB: loop body
LE: loop exit
PB: predicated region body
PF: predicated region fallthrough
CT: control target
= control target key end

     0   :  { %8 = vsyncpa [#allocation3], 0  ;;  %s888_s0 = inlined_call_operand.hbm [shape: f32[256,128], index: 0, kind: input, shape index: {}]   ;;  %s889_s1 = inlined_call_operand.hbm [shape: f32[128,256], index: 1, kind: input, shape index: {}]   ;;  %s890_s2 = inlined_call_operand.hbm [shape: f32[1,256], index: 2, kind: input, shape index: {}]   ;;  %s891_s3 = inlined_call_operand.hbm [shape: f32[256,256], index: 3, kind: output, shape index: {}]  }
   0x1   :  { %9 = vsyncpa [#allocation6], 0  ;;  %s28_s14 = sshll.u32 %s889_s1, 4  ;;  %s29_s14 = int_to_ptr.hbm [resolvable:$true] %s28_s14 }
   0x2   :  { %10 = vsyncpa [#allocation4], 0  ;;  %s614_s15 = smov [#allocation5]   ;;  %s15_s19 = sshll.u32 %s888_s0, 4  ;;  %s16_s19 = int_to_ptr.hbm [resolvable:$true] %s15_s19 }
   0x3   :  { %s30_s16 = sshll.u32 %s614_s15, 4  ;;  %s615_s20 = smov 256   ;;  %s31_s16 = int_to_ptr.vmem [resolvable:$true] %s30_s16 }
   0x4   :  { %s616_s21 = smov 16   ;;  %s617_s22 = smov [#allocation2]  }
   0x5   :  { %36 = dma.hbm_to_vmem [thread:$0]  %s29_s14, 4096, %s31_s16, [#allocation6], %s615_s20, %s615_s20, %s616_s21  }
   0x6   :  { %s17_s23 = sshll.u32 %s617_s22, 4  ;;  %s618_s1 = smov 128   ;;  %s18_s23 = int_to_ptr.vmem [resolvable:$true] %s17_s23 }
   0x7   :  { %s619_s24 = smov 8   ;;  %s42_s27 = sshll.u32 %s890_s2, 4  ;;  %s43_s27 = int_to_ptr.hbm [resolvable:$true] %s42_s27 }
   0x8   :  { %23 = dma.hbm_to_vmem [thread:$0]  %s16_s19, 4096, %s18_s23, [#allocation3], %s618_s1, %s618_s1, %s619_s24  }
   0x9   :  { %s620_s28 = smov [#allocation7]  }
   0xa   :  { %s44_s0 = sshll.u32 %s620_s28, 4  ;;  %s45_s0 = int_to_ptr.vmem [resolvable:$true] %s44_s0 }
   0xb   :  { %47 = dma.hbm_to_vmem [thread:$0]  %s43_s27, 32, %s45_s0, [#allocation6]  }
   0xc   :  { %608 = dma.done.wait [#allocation3], 4096  }
   0xd   :  { %609 = vsyncadd [#allocation3], 4294963200 }
   0xe   :  { %610 = dma.done.wait [#allocation6], 4128  }
   0xf   :  { %611 = vsyncadd [#allocation6], 4294963168  ;;  %v122_v0 = vld [vmem:[#allocation5 + $0xf0] sm:$0xff]  ;;  %v120_v1 = vld [vmem:[#allocation5 + $0xe0] sm:$0xff]  ;;  %s621_s2 = smov [#allocation8]   ;;  %s458_s5 = sshll.u32 %s891_s3, 4  ;;  %s459_s5 = int_to_ptr.hbm [resolvable:$true] %s458_s5 }
  0x10   :  { %v123_v2 = vld [vmem:[#allocation5 + $0xf8] sm:$0xff]  ;;  %472 = vmatpush.msra.mxu2 %v122_v0  ;;  %v121_v3 = vld [vmem:[#allocation5 + $0xe8] sm:$0xff]  ;;  %v118_v4 = vld [vmem:[#allocation5 + $0xd0] sm:$0xff]  ;;  %130 = vmatpush.msra.mxu0 %v122_v0  ;;  %s456_s29 = sshll.u32 %s621_s2, 4  ;;  %s457_s29 = int_to_ptr.vmem [resolvable:$true] %s456_s29 }
  0x11   :  { %488 = vmatpush.msra.mxu3 %v123_v2  ;;  %v119_v5 = vld [vmem:[#allocation5 + $0xd8] sm:$0xff]  ;;  %243 = vmatpush.msra.mxu1 %v123_v2  ;;  %v116_v6 = vld [vmem:[#allocation5 + $0xc0] sm:$0xff]  ;;  %v117_v7 = vld [vmem:[#allocation5 + $0xc8] sm:$0xff] }
  0x12   :  { %473 = vmatpush.msra.mxu2 %v120_v1  ;;  %131 = vmatpush.msra.mxu0 %v120_v1  ;;  %v114_v8 = vld [vmem:[#allocation5 + $0xb0] sm:$0xff]  ;;  %v115_v9 = vld [vmem:[#allocation5 + $0xb8] sm:$0xff]  ;;  %v112_v10 = vld [vmem:[#allocation5 + $0xa0] sm:$0xff] }
  0x13   :  { %489 = vmatpush.msra.mxu3 %v121_v3  ;;  %244 = vmatpush.msra.mxu1 %v121_v3  ;;  %v113_v11 = vld [vmem:[#allocation5 + $0xa8] sm:$0xff]  ;;  %v110_v12 = vld [vmem:[#allocation5 + $0x90] sm:$0xff]  ;;  %v111_v13 = vld [vmem:[#allocation5 + $0x98] sm:$0xff] }
  0x14   :  { %474 = vmatpush.msra.mxu2 %v118_v4  ;;  %132 = vmatpush.msra.mxu0 %v118_v4  ;;  %v108_v14 = vld [vmem:[#allocation5 + $0x80] sm:$0xff]  ;;  %v109_v15 = vld [vmem:[#allocation5 + $0x88] sm:$0xff]  ;;  %v106_v16 = vld [vmem:[#allocation5 + $0x70] sm:$0xff] }
  0x15   :  { %490 = vmatpush.msra.mxu3 %v119_v5  ;;  %245 = vmatpush.msra.mxu1 %v119_v5  ;;  %v107_v17 = vld [vmem:[#allocation5 + $0x78] sm:$0xff]  ;;  %v104_v18 = vld [vmem:[#allocation5 + $0x60] sm:$0xff]  ;;  %v105_v19 = vld [vmem:[#allocation5 + $0x68] sm:$0xff] }
  0x16   :  { %475 = vmatpush.msra.mxu2 %v116_v6  ;;  %133 = vmatpush.msra.mxu0 %v116_v6  ;;  %v102_v20 = vld [vmem:[#allocation5 + $0x50] sm:$0xff]  ;;  %v103_v21 = vld [vmem:[#allocation5 + $0x58] sm:$0xff]  ;;  %v100_v22 = vld [vmem:[#allocation5 + $0x40] sm:$0xff] }
  0x17   :  { %491 = vmatpush.msra.mxu3 %v117_v7  ;;  %246 = vmatpush.msra.mxu1 %v117_v7  ;;  %v101_v23 = vld [vmem:[#allocation5 + $0x48] sm:$0xff]  ;;  %v98_v24 = vld [vmem:[#allocation5 + $0x30] sm:$0xff]  ;;  %v99_v25 = vld [vmem:[#allocation5 + $0x38] sm:$0xff] }
  0x18   :  { %476 = vmatpush.msra.mxu2 %v114_v8  ;;  %134 = vmatpush.msra.mxu0 %v114_v8  ;;  %v96_v26 = vld [vmem:[#allocation5 + $0x20] sm:$0xff]  ;;  %v97_v27 = vld [vmem:[#allocation5 + $0x28] sm:$0xff]  ;;  %v94_v28 = vld [vmem:[#allocation5 + $0x10] sm:$0xff] }
  0x19   :  { %492 = vmatpush.msra.mxu3 %v115_v9  ;;  %247 = vmatpush.msra.mxu1 %v115_v9  ;;  %v95_v29 = vld [vmem:[#allocation5 + $0x18] sm:$0xff]  ;;  %v92_v30 = vld [vmem:[#allocation5] sm:$0xff]  ;;  %v93_v31 = vld [vmem:[#allocation5 + $0x8] sm:$0xff] }
  0x1a   :  { %477 = vmatpush.msra.mxu2 %v112_v10  ;;  %135 = vmatpush.msra.mxu0 %v112_v10  ;;  %v654_v32 = vld [vmem:[#allocation2 + $0x80] sm:$0xff]  ;;  %v662_v34 = vld [vmem:[#allocation2 + $0x88] sm:$0xff]  ;;  %v670_v36 = vld [vmem:[#allocation2 + $0x90] sm:$0xff] }
  0x1b   :  { %493 = vmatpush.msra.mxu3 %v113_v11  ;;  %248 = vmatpush.msra.mxu1 %v113_v11  ;;  %v656_v33 = vld [vmem:[#allocation2] sm:$0xff]  ;;  %v664_v35 = vld [vmem:[#allocation2 + $0x8] sm:$0xff]  ;;  %v672_v37 = vld [vmem:[#allocation2 + $0x10] sm:$0xff] }
  0x1c   :  { %478 = vmatpush.msra.mxu2 %v110_v12  ;;  %136 = vmatpush.msra.mxu0 %v110_v12  ;;  %v678_v38 = vld [vmem:[#allocation2 + $0x98] sm:$0xff]  ;;  %v686_v40 = vld [vmem:[#allocation2 + $0xa0] sm:$0xff]  ;;  %v694_v42 = vld [vmem:[#allocation2 + $0xa8] sm:$0xff] }
  0x1d   :  { %494 = vmatpush.msra.mxu3 %v111_v13  ;;  %249 = vmatpush.msra.mxu1 %v111_v13  ;;  %v680_v39 = vld [vmem:[#allocation2 + $0x18] sm:$0xff]  ;;  %v688_v41 = vld [vmem:[#allocation2 + $0x20] sm:$0xff]  ;;  %v696_v43 = vld [vmem:[#allocation2 + $0x28] sm:$0xff] }
  0x1e   :  { %479 = vmatpush.msra.mxu2 %v108_v14  ;;  %137 = vmatpush.msra.mxu0 %v108_v14  ;;  %v702_v44 = vld [vmem:[#allocation2 + $0xb0] sm:$0xff]  ;;  %v710_v46 = vld [vmem:[#allocation2 + $0xb8] sm:$0xff]  ;;  %v718_v48 = vld [vmem:[#allocation2 + $0xc0] sm:$0xff] }
  0x1f   :  { %495 = vmatpush.msra.mxu3 %v109_v15  ;;  %250 = vmatpush.msra.mxu1 %v109_v15  ;;  %v704_v45 = vld [vmem:[#allocation2 + $0x30] sm:$0xff]  ;;  %v712_v47 = vld [vmem:[#allocation2 + $0x38] sm:$0xff]  ;;  %v720_v49 = vld [vmem:[#allocation2 + $0x40] sm:$0xff] }
  0x20   :  { %480 = vmatpush.msra.mxu2 %v106_v16  ;;  %138 = vmatpush.msra.mxu0 %v106_v16  ;;  %v726_v50 = vld [vmem:[#allocation2 + $0xc8] sm:$0xff]  ;;  %v734_v52 = vld [vmem:[#allocation2 + $0xd0] sm:$0xff]  ;;  %v742_v54 = vld [vmem:[#allocation2 + $0xd8] sm:$0xff] }
  0x21   :  { %496 = vmatpush.msra.mxu3 %v107_v17  ;;  %251 = vmatpush.msra.mxu1 %v107_v17  ;;  %v728_v51 = vld [vmem:[#allocation2 + $0x48] sm:$0xff]  ;;  %v736_v53 = vld [vmem:[#allocation2 + $0x50] sm:$0xff]  ;;  %v744_v55 = vld [vmem:[#allocation2 + $0x58] sm:$0xff] }
  0x22   :  { %481 = vmatpush.msra.mxu2 %v104_v18  ;;  %139 = vmatpush.msra.mxu0 %v104_v18  ;;  %v750_v56 = vld [vmem:[#allocation2 + $0xe0] sm:$0xff]  ;;  %v758_v58 = vld [vmem:[#allocation2 + $0xe8] sm:$0xff]  ;;  %v766_v60 = vld [vmem:[#allocation2 + $0xf0] sm:$0xff] }
  0x23   :  { %497 = vmatpush.msra.mxu3 %v105_v19  ;;  %252 = vmatpush.msra.mxu1 %v105_v19  ;;  %v752_v57 = vld [vmem:[#allocation2 + $0x60] sm:$0xff]  ;;  %v760_v59 = vld [vmem:[#allocation2 + $0x68] sm:$0xff]  ;;  %v768_v61 = vld [vmem:[#allocation2 + $0x70] sm:$0xff] }
  0x24   :  { %482 = vmatpush.msra.mxu2 %v102_v20  ;;  %140 = vmatpush.msra.mxu0 %v102_v20  ;;  %v774_v62 = vld [vmem:[#allocation2 + $0xf8] sm:$0xff]  ;;  %v124_v0 = vld [vmem:[#allocation7] sm:$0x3] }
  0x25   :  { %498 = vmatpush.msra.mxu3 %v103_v21  ;;  %253 = vmatpush.msra.mxu1 %v103_v21  ;;  %v776_v63 = vld [vmem:[#allocation2 + $0x78] sm:$0xff]  ;;  %v782_v1 = vperm.slane %v124_v0, 0  ;;  %v784_v2 = vperm.slane %v124_v0, 1 }
  0x26   :  { %483 = vmatpush.msra.mxu2 %v100_v22  ;;  %141 = vmatpush.msra.mxu0 %v100_v22 }
  0x27   :  { %499 = vmatpush.msra.mxu3 %v101_v23  ;;  %254 = vmatpush.msra.mxu1 %v101_v23 }
  0x28   :  { %484 = vmatpush.msra.mxu2 %v98_v24  ;;  %142 = vmatpush.msra.mxu0 %v98_v24 }
  0x29   :  { %500 = vmatpush.msra.mxu3 %v99_v25  ;;  %255 = vmatpush.msra.mxu1 %v99_v25 }
  0x2a   :  { %485 = vmatpush.msra.mxu2 %v96_v26  ;;  %143 = vmatpush.msra.mxu0 %v96_v26 }
  0x2b   :  { %501 = vmatpush.msra.mxu3 %v97_v27  ;;  %256 = vmatpush.msra.mxu1 %v97_v27 }
  0x2c   :  { %486 = vmatpush.msra.mxu2 %v94_v28  ;;  %144 = vmatpush.msra.mxu0 %v94_v28 }
  0x2d   :  { %502 = vmatpush.msra.mxu3 %v95_v29  ;;  %257 = vmatpush.msra.mxu1 %v95_v29 }
  0x2e   :  { %487 = vmatpush.msra.mxu2 %v92_v30  ;;  %145 = vmatpush.msra.mxu0 %v92_v30 }
  0x2f   :  { %503 = vmatpush.msra.mxu3 %v93_v31  ;;  %194 = vmatmul.f32.vlgmr.msra.gmra.mxu2 %v654_v32 }
  0x30   :  { %307 = vmatmul.f32.vlgmr.msra.gmra.mxu3 %v654_v32  ;;  %258 = vmatpush.msra.mxu1 %v93_v31 }
  0x31   :  { %146 = vmatmul.f32.vlgmr.msra.gmra.mxu0 %v656_v33  ;;  %259 = vmatmul.f32.vlgmr.msra.gmra.mxu1 %v656_v33 }
  0x37   :  { %197 = vmatmul.f32.gmra.mxu2 %v662_v34 }
  0x38   :  { %310 = vmatmul.f32.gmra.mxu3 %v662_v34 }
  0x39   :  { %149 = vmatmul.f32.gmra.mxu0 %v664_v35  ;;  %262 = vmatmul.f32.gmra.mxu1 %v664_v35 }
  0x3f   :  { %200 = vmatmul.f32.gmra.mxu2 %v670_v36 }
  0x40   :  { %313 = vmatmul.f32.gmra.mxu3 %v670_v36 }
  0x41   :  { %152 = vmatmul.f32.gmra.mxu0 %v672_v37  ;;  %265 = vmatmul.f32.gmra.mxu1 %v672_v37 }
  0x47   :  { %203 = vmatmul.f32.gmra.mxu2 %v678_v38 }
  0x48   :  { %316 = vmatmul.f32.gmra.mxu3 %v678_v38 }
  0x49   :  { %155 = vmatmul.f32.gmra.mxu0 %v680_v39  ;;  %268 = vmatmul.f32.gmra.mxu1 %v680_v39 }
  0x4f   :  { %206 = vmatmul.f32.gmra.mxu2 %v686_v40 }
  0x50   :  { %319 = vmatmul.f32.gmra.mxu3 %v686_v40 }
  0x51   :  { %158 = vmatmul.f32.gmra.mxu0 %v688_v41  ;;  %271 = vmatmul.f32.gmra.mxu1 %v688_v41 }
  0x57   :  { %209 = vmatmul.f32.gmra.mxu2 %v694_v42 }
  0x58   :  { %322 = vmatmul.f32.gmra.mxu3 %v694_v42 }
  0x59   :  { %161 = vmatmul.f32.gmra.mxu0 %v696_v43  ;;  %274 = vmatmul.f32.gmra.mxu1 %v696_v43 }
  0x5f   :  { %212 = vmatmul.f32.gmra.mxu2 %v702_v44 }
  0x60   :  { %325 = vmatmul.f32.gmra.mxu3 %v702_v44 }
  0x61   :  { %164 = vmatmul.f32.gmra.mxu0 %v704_v45  ;;  %277 = vmatmul.f32.gmra.mxu1 %v704_v45 }
  0x67   :  { %215 = vmatmul.f32.gmra.mxu2 %v710_v46 }
  0x68   :  { %328 = vmatmul.f32.gmra.mxu3 %v710_v46 }
  0x69   :  { %167 = vmatmul.f32.gmra.mxu0 %v712_v47  ;;  %280 = vmatmul.f32.gmra.mxu1 %v712_v47 }
  0x6f   :  { %218 = vmatmul.f32.gmra.mxu2 %v718_v48 }
  0x70   :  { %331 = vmatmul.f32.gmra.mxu3 %v718_v48 }
  0x71   :  { %170 = vmatmul.f32.gmra.mxu0 %v720_v49  ;;  %283 = vmatmul.f32.gmra.mxu1 %v720_v49 }
  0x77   :  { %221 = vmatmul.f32.gmra.mxu2 %v726_v50 }
  0x78   :  { %334 = vmatmul.f32.gmra.mxu3 %v726_v50 }
  0x79   :  { %173 = vmatmul.f32.gmra.mxu0 %v728_v51  ;;  %286 = vmatmul.f32.gmra.mxu1 %v728_v51 }
  0x7f   :  { %224 = vmatmul.f32.gmra.mxu2 %v734_v52 }
  0x80   :  { %337 = vmatmul.f32.gmra.mxu3 %v734_v52 }
  0x81   :  { %176 = vmatmul.f32.gmra.mxu0 %v736_v53  ;;  %289 = vmatmul.f32.gmra.mxu1 %v736_v53 }
  0x87   :  { %227 = vmatmul.f32.gmra.mxu2 %v742_v54 }
  0x88   :  { %340 = vmatmul.f32.gmra.mxu3 %v742_v54 }
  0x89   :  { %179 = vmatmul.f32.gmra.mxu0 %v744_v55  ;;  %292 = vmatmul.f32.gmra.mxu1 %v744_v55 }
  0x8f   :  { %230 = vmatmul.f32.gmra.mxu2 %v750_v56 }
  0x90   :  { %343 = vmatmul.f32.gmra.mxu3 %v750_v56 }
  0x91   :  { %182 = vmatmul.f32.gmra.mxu0 %v752_v57  ;;  %295 = vmatmul.f32.gmra.mxu1 %v752_v57 }
  0x97   :  { %233 = vmatmul.f32.gmra.mxu2 %v758_v58 }
  0x98   :  { %346 = vmatmul.f32.gmra.mxu3 %v758_v58 }
  0x99   :  { %185 = vmatmul.f32.gmra.mxu0 %v760_v59  ;;  %298 = vmatmul.f32.gmra.mxu1 %v760_v59 }
  0x9f   :  { %236 = vmatmul.f32.gmra.mxu2 %v766_v60 }
  0xa0   :  { %349 = vmatmul.f32.gmra.mxu3 %v766_v60 }
  0xa1   :  { %188 = vmatmul.f32.gmra.mxu0 %v768_v61  ;;  %301 = vmatmul.f32.gmra.mxu1 %v768_v61 }
  0xa7   :  { %239 = vmatmul.f32.gmra.mxu2 %v774_v62 }
  0xa8   :  { %352 = vmatmul.f32.gmra.mxu3 %v774_v62 }
  0xa9   :  { %191 = vmatmul.f32.gmra.mxu0 %v776_v63  ;;  %304 = vmatmul.f32.gmra.mxu1 %v776_v63 }
  0xae   :  { %v147_v3 = vpop.f32.mrf.mxu0  ;;  %v260_v4 = vpop.f32.mrf.mxu1 }
  0xaf   :  { %v148_v5 = vadd.f32 %v147_v3, %v782_v1  ;;  %v261_v6 = vadd.f32 %v260_v4, %v784_v2 }
  0xb1   :  { %v356_v7 = vadd.f32 %v148_v5, %v656_v33  ;;  %420 = vst [vmem:[#allocation8 + $0x8] sm:$0xff] %v261_v6 }
  0xb2   :  { %v195_v8 = vpop.f32.mrf.mxu2 }
  0xb3   :  { %v308_v9 = vpop.f32.mrf.mxu3  ;;  %388 = vst [vmem:[#allocation8] sm:$0xff] %v356_v7  ;;  %v196_v10 = vadd.f32 %v195_v8, %v782_v1 }
  0xb4   :  { %v309_v11 = vadd.f32 %v308_v9, %v784_v2 }
  0xb5   :  { %v372_v12 = vadd.f32 %v196_v10, %v654_v32 }
  0xb6   :  { %436 = vst [vmem:[#allocation8 + $0x108] sm:$0xff] %v309_v11  ;;  %v150_v13 = vpop.f32.mrf.mxu0  ;;  %v263_v14 = vpop.f32.mrf.mxu1 }
  0xb7   :  { %404 = vst [vmem:[#allocation8 + $0x100] sm:$0xff] %v372_v12  ;;  %v151_v15 = vadd.f32 %v150_v13, %v782_v1  ;;  %v264_v16 = vadd.f32 %v263_v14, %v784_v2 }
  0xb9   :  { %v357_v17 = vadd.f32 %v151_v15, %v664_v35  ;;  %421 = vst [vmem:[#allocation8 + $0x18] sm:$0xff] %v264_v16 }
  0xba   :  { %v198_v18 = vpop.f32.mrf.mxu2 }
  0xbb   :  { %v311_v19 = vpop.f32.mrf.mxu3  ;;  %389 = vst [vmem:[#allocation8 + $0x10] sm:$0xff] %v357_v17  ;;  %v199_v20 = vadd.f32 %v198_v18, %v782_v1 }
  0xbc   :  { %v312_v21 = vadd.f32 %v311_v19, %v784_v2 }
  0xbd   :  { %v373_v22 = vadd.f32 %v199_v20, %v662_v34 }
  0xbe   :  { %437 = vst [vmem:[#allocation8 + $0x118] sm:$0xff] %v312_v21  ;;  %v153_v23 = vpop.f32.mrf.mxu0  ;;  %v266_v24 = vpop.f32.mrf.mxu1 }
  0xbf   :  { %405 = vst [vmem:[#allocation8 + $0x110] sm:$0xff] %v373_v22  ;;  %v154_v25 = vadd.f32 %v153_v23, %v782_v1  ;;  %v267_v26 = vadd.f32 %v266_v24, %v784_v2 }
  0xc1   :  { %v358_v27 = vadd.f32 %v154_v25, %v672_v37  ;;  %422 = vst [vmem:[#allocation8 + $0x28] sm:$0xff] %v267_v26 }
  0xc2   :  { %v201_v28 = vpop.f32.mrf.mxu2 }
  0xc3   :  { %v314_v29 = vpop.f32.mrf.mxu3  ;;  %390 = vst [vmem:[#allocation8 + $0x20] sm:$0xff] %v358_v27  ;;  %v202_v30 = vadd.f32 %v201_v28, %v782_v1 }
  0xc4   :  { %v315_v31 = vadd.f32 %v314_v29, %v784_v2 }
  0xc5   :  { %v374_v32 = vadd.f32 %v202_v30, %v670_v36 }
  0xc6   :  { %438 = vst [vmem:[#allocation8 + $0x128] sm:$0xff] %v315_v31  ;;  %v156_v33 = vpop.f32.mrf.mxu0  ;;  %v269_v34 = vpop.f32.mrf.mxu1 }
  0xc7   :  { %406 = vst [vmem:[#allocation8 + $0x120] sm:$0xff] %v374_v32  ;;  %v157_v35 = vadd.f32 %v156_v33, %v782_v1  ;;  %v270_v0 = vadd.f32 %v269_v34, %v784_v2 }
  0xc9   :  { %v359_v37 = vadd.f32 %v157_v35, %v680_v39  ;;  %423 = vst [vmem:[#allocation8 + $0x38] sm:$0xff] %v270_v0 }
  0xca   :  { %v204_v3 = vpop.f32.mrf.mxu2 }
  0xcb   :  { %v317_v4 = vpop.f32.mrf.mxu3  ;;  %391 = vst [vmem:[#allocation8 + $0x30] sm:$0xff] %v359_v37  ;;  %v205_v5 = vadd.f32 %v204_v3, %v782_v1 }
  0xcc   :  { %v318_v6 = vadd.f32 %v317_v4, %v784_v2 }
  0xcd   :  { %v375_v36 = vadd.f32 %v205_v5, %v678_v38 }
  0xce   :  { %439 = vst [vmem:[#allocation8 + $0x138] sm:$0xff] %v318_v6  ;;  %v159_v7 = vpop.f32.mrf.mxu0  ;;  %v272_v8 = vpop.f32.mrf.mxu1 }
  0xcf   :  { %407 = vst [vmem:[#allocation8 + $0x130] sm:$0xff] %v375_v36  ;;  %v160_v9 = vadd.f32 %v159_v7, %v782_v1  ;;  %v273_v10 = vadd.f32 %v272_v8, %v784_v2 }
  0xd1   :  { %v360_v39 = vadd.f32 %v160_v9, %v688_v41  ;;  %424 = vst [vmem:[#allocation8 + $0x48] sm:$0xff] %v273_v10 }
  0xd2   :  { %v207_v11 = vpop.f32.mrf.mxu2 }
  0xd3   :  { %v320_v12 = vpop.f32.mrf.mxu3  ;;  %392 = vst [vmem:[#allocation8 + $0x40] sm:$0xff] %v360_v39  ;;  %v208_v13 = vadd.f32 %v207_v11, %v782_v1 }
  0xd4   :  { %v321_v14 = vadd.f32 %v320_v12, %v784_v2 }
  0xd5   :  { %v376_v38 = vadd.f32 %v208_v13, %v686_v40 }
  0xd6   :  { %440 = vst [vmem:[#allocation8 + $0x148] sm:$0xff] %v321_v14  ;;  %v162_v15 = vpop.f32.mrf.mxu0  ;;  %v275_v16 = vpop.f32.mrf.mxu1 }
  0xd7   :  { %408 = vst [vmem:[#allocation8 + $0x140] sm:$0xff] %v376_v38  ;;  %v163_v17 = vadd.f32 %v162_v15, %v782_v1  ;;  %v276_v18 = vadd.f32 %v275_v16, %v784_v2 }
  0xd9   :  { %v361_v41 = vadd.f32 %v163_v17, %v696_v43  ;;  %425 = vst [vmem:[#allocation8 + $0x58] sm:$0xff] %v276_v18 }
  0xda   :  { %v210_v19 = vpop.f32.mrf.mxu2 }
  0xdb   :  { %v323_v20 = vpop.f32.mrf.mxu3  ;;  %393 = vst [vmem:[#allocation8 + $0x50] sm:$0xff] %v361_v41  ;;  %v211_v21 = vadd.f32 %v210_v19, %v782_v1 }
  0xdc   :  { %v324_v22 = vadd.f32 %v323_v20, %v784_v2 }
  0xdd   :  { %v377_v40 = vadd.f32 %v211_v21, %v694_v42 }
  0xde   :  { %441 = vst [vmem:[#allocation8 + $0x158] sm:$0xff] %v324_v22  ;;  %v165_v23 = vpop.f32.mrf.mxu0  ;;  %v278_v24 = vpop.f32.mrf.mxu1 }
  0xdf   :  { %409 = vst [vmem:[#allocation8 + $0x150] sm:$0xff] %v377_v40  ;;  %v166_v25 = vadd.f32 %v165_v23, %v782_v1  ;;  %v279_v26 = vadd.f32 %v278_v24, %v784_v2 }
  0xe1   :  { %v362_v43 = vadd.f32 %v166_v25, %v704_v45  ;;  %426 = vst [vmem:[#allocation8 + $0x68] sm:$0xff] %v279_v26 }
  0xe2   :  { %v213_v27 = vpop.f32.mrf.mxu2 }
  0xe3   :  { %v326_v28 = vpop.f32.mrf.mxu3  ;;  %394 = vst [vmem:[#allocation8 + $0x60] sm:$0xff] %v362_v43  ;;  %v214_v29 = vadd.f32 %v213_v27, %v782_v1 }
  0xe4   :  { %v327_v30 = vadd.f32 %v326_v28, %v784_v2 }
  0xe5   :  { %v378_v42 = vadd.f32 %v214_v29, %v702_v44 }
  0xe6   :  { %442 = vst [vmem:[#allocation8 + $0x168] sm:$0xff] %v327_v30  ;;  %v168_v31 = vpop.f32.mrf.mxu0  ;;  %v281_v32 = vpop.f32.mrf.mxu1 }
  0xe7   :  { %410 = vst [vmem:[#allocation8 + $0x160] sm:$0xff] %v378_v42  ;;  %v169_v33 = vadd.f32 %v168_v31, %v782_v1  ;;  %v282_v34 = vadd.f32 %v281_v32, %v784_v2 }
  0xe9   :  { %v363_v45 = vadd.f32 %v169_v33, %v712_v47  ;;  %427 = vst [vmem:[#allocation8 + $0x78] sm:$0xff] %v282_v34 }
  0xea   :  { %v216_v35 = vpop.f32.mrf.mxu2 }
  0xeb   :  { %v329_v0 = vpop.f32.mrf.mxu3  ;;  %395 = vst [vmem:[#allocation8 + $0x70] sm:$0xff] %v363_v45  ;;  %v217_v37 = vadd.f32 %v216_v35, %v782_v1 }
  0xec   :  { %v330_v3 = vadd.f32 %v329_v0, %v784_v2 }
  0xed   :  { %v379_v44 = vadd.f32 %v217_v37, %v710_v46 }
  0xee   :  { %443 = vst [vmem:[#allocation8 + $0x178] sm:$0xff] %v330_v3  ;;  %v171_v4 = vpop.f32.mrf.mxu0  ;;  %v284_v5 = vpop.f32.mrf.mxu1 }
  0xef   :  { %411 = vst [vmem:[#allocation8 + $0x170] sm:$0xff] %v379_v44  ;;  %v172_v6 = vadd.f32 %v171_v4, %v782_v1  ;;  %v285_v36 = vadd.f32 %v284_v5, %v784_v2 }
  0xf1   :  { %v364_v47 = vadd.f32 %v172_v6, %v720_v49  ;;  %428 = vst [vmem:[#allocation8 + $0x88] sm:$0xff] %v285_v36 }
  0xf2   :  { %v219_v7 = vpop.f32.mrf.mxu2 }
  0xf3   :  { %v332_v8 = vpop.f32.mrf.mxu3  ;;  %396 = vst [vmem:[#allocation8 + $0x80] sm:$0xff] %v364_v47  ;;  %v220_v9 = vadd.f32 %v219_v7, %v782_v1 }
  0xf4   :  { %v333_v10 = vadd.f32 %v332_v8, %v784_v2 }
  0xf5   :  { %v380_v46 = vadd.f32 %v220_v9, %v718_v48 }
  0xf6   :  { %444 = vst [vmem:[#allocation8 + $0x188] sm:$0xff] %v333_v10  ;;  %v174_v39 = vpop.f32.mrf.mxu0  ;;  %v287_v11 = vpop.f32.mrf.mxu1 }
  0xf7   :  { %412 = vst [vmem:[#allocation8 + $0x180] sm:$0xff] %v380_v46  ;;  %v175_v12 = vadd.f32 %v174_v39, %v782_v1  ;;  %v288_v13 = vadd.f32 %v287_v11, %v784_v2 }
  0xf9   :  { %v365_v49 = vadd.f32 %v175_v12, %v728_v51  ;;  %429 = vst [vmem:[#allocation8 + $0x98] sm:$0xff] %v288_v13 }
  0xfa   :  { %v222_v14 = vpop.f32.mrf.mxu2 }
  0xfb   :  { %v335_v38 = vpop.f32.mrf.mxu3  ;;  %397 = vst [vmem:[#allocation8 + $0x90] sm:$0xff] %v365_v49  ;;  %v223_v15 = vadd.f32 %v222_v14, %v782_v1 }
  0xfc   :  { %v336_v16 = vadd.f32 %v335_v38, %v784_v2 }
  0xfd   :  { %v381_v48 = vadd.f32 %v223_v15, %v726_v50 }
  0xfe   :  { %445 = vst [vmem:[#allocation8 + $0x198] sm:$0xff] %v336_v16  ;;  %v177_v17 = vpop.f32.mrf.mxu0  ;;  %v290_v18 = vpop.f32.mrf.mxu1 }
  0xff   :  { %413 = vst [vmem:[#allocation8 + $0x190] sm:$0xff] %v381_v48  ;;  %v178_v41 = vadd.f32 %v177_v17, %v782_v1  ;;  %v291_v19 = vadd.f32 %v290_v18, %v784_v2 }
 0x101   :  { %v366_v51 = vadd.f32 %v178_v41, %v736_v53  ;;  %430 = vst [vmem:[#allocation8 + $0xa8] sm:$0xff] %v291_v19 }
 0x102   :  { %v225_v20 = vpop.f32.mrf.mxu2 }
 0x103   :  { %v338_v21 = vpop.f32.mrf.mxu3  ;;  %398 = vst [vmem:[#allocation8 + $0xa0] sm:$0xff] %v366_v51  ;;  %v226_v22 = vadd.f32 %v225_v20, %v782_v1 }
 0x104   :  { %v339_v40 = vadd.f32 %v338_v21, %v784_v2 }
 0x105   :  { %v382_v50 = vadd.f32 %v226_v22, %v734_v52 }
 0x106   :  { %446 = vst [vmem:[#allocation8 + $0x1a8] sm:$0xff] %v339_v40  ;;  %v180_v23 = vpop.f32.mrf.mxu0  ;;  %v293_v24 = vpop.f32.mrf.mxu1 }
 0x107   :  { %414 = vst [vmem:[#allocation8 + $0x1a0] sm:$0xff] %v382_v50  ;;  %v181_v25 = vadd.f32 %v180_v23, %v782_v1  ;;  %v294_v26 = vadd.f32 %v293_v24, %v784_v2 }
 0x109   :  { %v367_v53 = vadd.f32 %v181_v25, %v744_v55  ;;  %431 = vst [vmem:[#allocation8 + $0xb8] sm:$0xff] %v294_v26 }
 0x10a   :  { %v228_v43 = vpop.f32.mrf.mxu2 }
 0x10b   :  { %v341_v27 = vpop.f32.mrf.mxu3  ;;  %399 = vst [vmem:[#allocation8 + $0xb0] sm:$0xff] %v367_v53  ;;  %v229_v28 = vadd.f32 %v228_v43, %v782_v1 }
 0x10c   :  { %v342_v29 = vadd.f32 %v341_v27, %v784_v2 }
 0x10d   :  { %v383_v52 = vadd.f32 %v229_v28, %v742_v54 }
 0x10e   :  { %447 = vst [vmem:[#allocation8 + $0x1b8] sm:$0xff] %v342_v29  ;;  %v183_v30 = vpop.f32.mrf.mxu0  ;;  %v296_v42 = vpop.f32.mrf.mxu1 }
 0x10f   :  { %415 = vst [vmem:[#allocation8 + $0x1b0] sm:$0xff] %v383_v52  ;;  %v184_v31 = vadd.f32 %v183_v30, %v782_v1  ;;  %v297_v32 = vadd.f32 %v296_v42, %v784_v2 }
 0x111   :  { %v368_v55 = vadd.f32 %v184_v31, %v752_v57  ;;  %432 = vst [vmem:[#allocation8 + $0xc8] sm:$0xff] %v297_v32 }
 0x112   :  { %v231_v33 = vpop.f32.mrf.mxu2 }
 0x113   :  { %v344_v34 = vpop.f32.mrf.mxu3  ;;  %400 = vst [vmem:[#allocation8 + $0xc0] sm:$0xff] %v368_v55  ;;  %v232_v45 = vadd.f32 %v231_v33, %v782_v1 }
 0x114   :  { %v345_v35 = vadd.f32 %v344_v34, %v784_v2 }
 0x115   :  { %v384_v54 = vadd.f32 %v232_v45, %v750_v56 }
 0x116   :  { %448 = vst [vmem:[#allocation8 + $0x1c8] sm:$0xff] %v345_v35  ;;  %v186_v0 = vpop.f32.mrf.mxu0  ;;  %v299_v37 = vpop.f32.mrf.mxu1 }
 0x117   :  { %416 = vst [vmem:[#allocation8 + $0x1c0] sm:$0xff] %v384_v54  ;;  %v187_v3 = vadd.f32 %v186_v0, %v782_v1  ;;  %v300_v44 = vadd.f32 %v299_v37, %v784_v2 }
 0x119   :  { %v369_v57 = vadd.f32 %v187_v3, %v760_v59  ;;  %433 = vst [vmem:[#allocation8 + $0xd8] sm:$0xff] %v300_v44 }
 0x11a   :  { %v234_v4 = vpop.f32.mrf.mxu2 }
 0x11b   :  { %v347_v5 = vpop.f32.mrf.mxu3  ;;  %401 = vst [vmem:[#allocation8 + $0xd0] sm:$0xff] %v369_v57  ;;  %v235_v6 = vadd.f32 %v234_v4, %v782_v1 }
 0x11c   :  { %v348_v36 = vadd.f32 %v347_v5, %v784_v2 }
 0x11d   :  { %v385_v56 = vadd.f32 %v235_v6, %v758_v58 }
 0x11e   :  { %449 = vst [vmem:[#allocation8 + $0x1d8] sm:$0xff] %v348_v36  ;;  %v189_v47 = vpop.f32.mrf.mxu0  ;;  %v302_v7 = vpop.f32.mrf.mxu1 }
 0x11f   :  { %417 = vst [vmem:[#allocation8 + $0x1d0] sm:$0xff] %v385_v56  ;;  %v190_v8 = vadd.f32 %v189_v47, %v782_v1  ;;  %v303_v9 = vadd.f32 %v302_v7, %v784_v2 }
 0x121   :  { %v370_v59 = vadd.f32 %v190_v8, %v768_v61  ;;  %434 = vst [vmem:[#allocation8 + $0xe8] sm:$0xff] %v303_v9 }
 0x122   :  { %v237_v10 = vpop.f32.mrf.mxu2 }
 0x123   :  { %v350_v46 = vpop.f32.mrf.mxu3  ;;  %402 = vst [vmem:[#allocation8 + $0xe0] sm:$0xff] %v370_v59  ;;  %v238_v39 = vadd.f32 %v237_v10, %v782_v1 }
 0x124   :  { %v351_v11 = vadd.f32 %v350_v46, %v784_v2 }
 0x125   :  { %v386_v58 = vadd.f32 %v238_v39, %v766_v60 }
 0x126   :  { %450 = vst [vmem:[#allocation8 + $0x1e8] sm:$0xff] %v351_v11  ;;  %v192_v12 = vpop.f32.mrf.mxu0  ;;  %v305_v13 = vpop.f32.mrf.mxu1 }
 0x127   :  { %418 = vst [vmem:[#allocation8 + $0x1e0] sm:$0xff] %v386_v58  ;;  %v193_v49 = vadd.f32 %v192_v12, %v782_v1  ;;  %v306_v14 = vadd.f32 %v305_v13, %v784_v2 }
 0x129   :  { %v371_v61 = vadd.f32 %v193_v49, %v776_v63  ;;  %435 = vst [vmem:[#allocation8 + $0xf8] sm:$0xff] %v306_v14 }
 0x12a   :  { %v240_v38 = vpop.f32.mrf.mxu2 }
 0x12b   :  { %v353_v15 = vpop.f32.mrf.mxu3  ;;  %403 = vst [vmem:[#allocation8 + $0xf0] sm:$0xff] %v371_v61  ;;  %v241_v60 = vadd.f32 %v240_v38, %v782_v1 }
 0x12c   :  { %v354_v16 = vadd.f32 %v353_v15, %v784_v2 }
 0x12d   :  { %v387_v48 = vadd.f32 %v241_v60, %v774_v62 }
 0x12e   :  { %451 = vst [vmem:[#allocation8 + $0x1f8] sm:$0xff] %v354_v16 }
 0x12f   :  { %419 = vst [vmem:[#allocation8 + $0x1f0] sm:$0xff] %v387_v48 }
 0x130   :  { %464 = dma.vmem_to_hbm [thread:$0]  %s457_s29, 8192, %s459_s5, [#allocation4], %s615_s20, %s615_s20, %s616_s21  }
 0x131   :  { %612 = dma.done.wait [#allocation4], 8192  }
 0x132   :  { %613 = vsyncadd [#allocation4], 4294959104 }
 0x133   :  { %469 = vsyncpa [#allocation3], 1 }
 0x134   :  { %470 = vsyncpa [#allocation6], 1 }
 0x135   :  { %471 = vsyncpa [#allocation4], 1 }

// kernel: tpu_custom_call.1
= control target key start
LH: loop header
LB: loop body
LE: loop exit
PB: predicated region body
PF: predicated region fallthrough
CT: control target
= control target key end

     0   :  { %8 = vsyncpa [#allocation3], 0  ;;  %s888_s0 = inlined_call_operand.hbm [shape: f32[256,128], index: 0, kind: input, shape index: {}]   ;;  %s889_s1 = inlined_call_operand.hbm [shape: f32[128,256], index: 1, kind: input, shape index: {}]   ;;  %s890_s2 = inlined_call_operand.hbm [shape: f32[1,256], index: 2, kind: input, shape index: {}]   ;;  %s891_s3 = inlined_call_operand.hbm [shape: f32[256,256], index: 3, kind: output, shape index: {}]  }
   0x1   :  { %9 = vsyncpa [#allocation6], 0  ;;  %s28_s14 = sshll.u32 %s889_s1, 4  ;;  %s29_s14 = int_to_ptr.hbm [resolvable:$true] %s28_s14 }
   0x2   :  { %10 = vsyncpa [#allocation4], 0  ;;  %s614_s15 = smov [#allocation5]   ;;  %s15_s19 = sshll.u32 %s888_s0, 4  ;;  %s16_s19 = int_to_ptr.hbm [resolvable:$true] %s15_s19 }
   0x3   :  { %s30_s16 = sshll.u32 %s614_s15, 4  ;;  %s615_s20 = smov 256   ;;  %s31_s16 = int_to_ptr.vmem [resolvable:$true] %s30_s16 }
   0x4   :  { %s616_s21 = smov 16   ;;  %s617_s22 = smov [#allocation2]  }
   0x5   :  { %36 = dma.hbm_to_vmem [thread:$0]  %s29_s14, 4096, %s31_s16, [#allocation6], %s615_s20, %s615_s20, %s616_s21  }
   0x6   :  { %s17_s23 = sshll.u32 %s617_s22, 4  ;;  %s618_s1 = smov 128   ;;  %s18_s23 = int_to_ptr.vmem [resolvable:$true] %s17_s23 }
   0x7   :  { %s619_s24 = smov 8   ;;  %s42_s27 = sshll.u32 %s890_s2, 4  ;;  %s43_s27 = int_to_ptr.hbm [resolvable:$true] %s42_s27 }
   0x8   :  { %23 = dma.hbm_to_vmem [thread:$0]  %s16_s19, 4096, %s18_s23, [#allocation3], %s618_s1, %s618_s1, %s619_s24  }
   0x9   :  { %s620_s28 = smov [#allocation7]  }
   0xa   :  { %s44_s0 = sshll.u32 %s620_s28, 4  ;;  %s45_s0 = int_to_ptr.vmem [resolvable:$true] %s44_s0 }
   0xb   :  { %47 = dma.hbm_to_vmem [thread:$0]  %s43_s27, 32, %s45_s0, [#allocation6]  }
   0xc   :  { %608 = dma.done.wait [#allocation3], 4096  }
   0xd   :  { %609 = vsyncadd [#allocation3], 4294963200 }
   0xe   :  { %610 = dma.done.wait [#allocation6], 4128  }
   0xf   :  { %611 = vsyncadd [#allocation6], 4294963168  ;;  %v122_v0 = vld [vmem:[#allocation5 + $0xf0] sm:$0xff]  ;;  %v120_v1 = vld [vmem:[#allocation5 + $0xe0] sm:$0xff]  ;;  %s621_s2 = smov [#allocation8]   ;;  %s458_s5 = sshll.u32 %s891_s3, 4  ;;  %s459_s5 = int_to_ptr.hbm [resolvable:$true] %s458_s5 }
  0x10   :  { %v123_v2 = vld [vmem:[#allocation5 + $0xf8] sm:$0xff]  ;;  %472 = vmatpush.msra.mxu2 %v122_v0  ;;  %v121_v3 = vld [vmem:[#allocation5 + $0xe8] sm:$0xff]  ;;  %v118_v4 = vld [vmem:[#allocation5 + $0xd0] sm:$0xff]  ;;  %130 = vmatpush.msra.mxu0 %v122_v0  ;;  %s456_s29 = sshll.u32 %s621_s2, 4  ;;  %s457_s29 = int_to_ptr.vmem [resolvable:$true] %s456_s29 }
  0x11   :  { %488 = vmatpush.msra.mxu3 %v123_v2  ;;  %v119_v5 = vld [vmem:[#allocation5 + $0xd8] sm:$0xff]  ;;  %243 = vmatpush.msra.mxu1 %v123_v2  ;;  %v116_v6 = vld [vmem:[#allocation5 + $0xc0] sm:$0xff]  ;;  %v117_v7 = vld [vmem:[#allocation5 + $0xc8] sm:$0xff] }
  0x12   :  { %473 = vmatpush.msra.mxu2 %v120_v1  ;;  %131 = vmatpush.msra.mxu0 %v120_v1  ;;  %v114_v8 = vld [vmem:[#allocation5 + $0xb0] sm:$0xff]  ;;  %v115_v9 = vld [vmem:[#allocation5 + $0xb8] sm:$0xff]  ;;  %v112_v10 = vld [vmem:[#allocation5 + $0xa0] sm:$0xff] }
  0x13   :  { %489 = vmatpush.msra.mxu3 %v121_v3  ;;  %244 = vmatpush.msra.mxu1 %v121_v3  ;;  %v113_v11 = vld [vmem:[#allocation5 + $0xa8] sm:$0xff]  ;;  %v110_v12 = vld [vmem:[#allocation5 + $0x90] sm:$0xff]  ;;  %v111_v13 = vld [vmem:[#allocation5 + $0x98] sm:$0xff] }
  0x14   :  { %474 = vmatpush.msra.mxu2 %v118_v4  ;;  %132 = vmatpush.msra.mxu0 %v118_v4  ;;  %v108_v14 = vld [vmem:[#allocation5 + $0x80] sm:$0xff]  ;;  %v109_v15 = vld [vmem:[#allocation5 + $0x88] sm:$0xff]  ;;  %v106_v16 = vld [vmem:[#allocation5 + $0x70] sm:$0xff] }
  0x15   :  { %490 = vmatpush.msra.mxu3 %v119_v5  ;;  %245 = vmatpush.msra.mxu1 %v119_v5  ;;  %v107_v17 = vld [vmem:[#allocation5 + $0x78] sm:$0xff]  ;;  %v104_v18 = vld [vmem:[#allocation5 + $0x60] sm:$0xff]  ;;  %v105_v19 = vld [vmem:[#allocation5 + $0x68] sm:$0xff] }
  0x16   :  { %475 = vmatpush.msra.mxu2 %v116_v6  ;;  %133 = vmatpush.msra.mxu0 %v116_v6  ;;  %v102_v20 = vld [vmem:[#allocation5 + $0x50] sm:$0xff]  ;;  %v103_v21 = vld [vmem:[#allocation5 + $0x58] sm:$0xff]  ;;  %v100_v22 = vld [vmem:[#allocation5 + $0x40] sm:$0xff] }
  0x17   :  { %491 = vmatpush.msra.mxu3 %v117_v7  ;;  %246 = vmatpush.msra.mxu1 %v117_v7  ;;  %v101_v23 = vld [vmem:[#allocation5 + $0x48] sm:$0xff]  ;;  %v98_v24 = vld [vmem:[#allocation5 + $0x30] sm:$0xff]  ;;  %v99_v25 = vld [vmem:[#allocation5 + $0x38] sm:$0xff] }
  0x18   :  { %476 = vmatpush.msra.mxu2 %v114_v8  ;;  %134 = vmatpush.msra.mxu0 %v114_v8  ;;  %v96_v26 = vld [vmem:[#allocation5 + $0x20] sm:$0xff]  ;;  %v97_v27 = vld [vmem:[#allocation5 + $0x28] sm:$0xff]  ;;  %v94_v28 = vld [vmem:[#allocation5 + $0x10] sm:$0xff] }
  0x19   :  { %492 = vmatpush.msra.mxu3 %v115_v9  ;;  %247 = vmatpush.msra.mxu1 %v115_v9  ;;  %v95_v29 = vld [vmem:[#allocation5 + $0x18] sm:$0xff]  ;;  %v92_v30 = vld [vmem:[#allocation5] sm:$0xff]  ;;  %v93_v31 = vld [vmem:[#allocation5 + $0x8] sm:$0xff] }
  0x1a   :  { %477 = vmatpush.msra.mxu2 %v112_v10  ;;  %135 = vmatpush.msra.mxu0 %v112_v10  ;;  %v654_v32 = vld [vmem:[#allocation2 + $0x80] sm:$0xff]  ;;  %v662_v34 = vld [vmem:[#allocation2 + $0x88] sm:$0xff]  ;;  %v670_v36 = vld [vmem:[#allocation2 + $0x90] sm:$0xff] }
  0x1b   :  { %493 = vmatpush.msra.mxu3 %v113_v11  ;;  %248 = vmatpush.msra.mxu1 %v113_v11  ;;  %v656_v33 = vld [vmem:[#allocation2] sm:$0xff]  ;;  %v664_v35 = vld [vmem:[#allocation2 + $0x8] sm:$0xff]  ;;  %v672_v37 = vld [vmem:[#allocation2 + $0x10] sm:$0xff] }
  0x1c   :  { %478 = vmatpush.msra.mxu2 %v110_v12  ;;  %136 = vmatpush.msra.mxu0 %v110_v12  ;;  %v678_v38 = vld [vmem:[#allocation2 + $0x98] sm:$0xff]  ;;  %v686_v40 = vld [vmem:[#allocation2 + $0xa0] sm:$0xff]  ;;  %v694_v42 = vld [vmem:[#allocation2 + $0xa8] sm:$0xff] }
  0x1d   :  { %494 = vmatpush.msra.mxu3 %v111_v13  ;;  %249 = vmatpush.msra.mxu1 %v111_v13  ;;  %v680_v39 = vld [vmem:[#allocation2 + $0x18] sm:$0xff]  ;;  %v688_v41 = vld [vmem:[#allocation2 + $0x20] sm:$0xff]  ;;  %v696_v43 = vld [vmem:[#allocation2 + $0x28] sm:$0xff] }
  0x1e   :  { %479 = vmatpush.msra.mxu2 %v108_v14  ;;  %137 = vmatpush.msra.mxu0 %v108_v14  ;;  %v702_v44 = vld [vmem:[#allocation2 + $0xb0] sm:$0xff]  ;;  %v710_v46 = vld [vmem:[#allocation2 + $0xb8] sm:$0xff]  ;;  %v718_v48 = vld [vmem:[#allocation2 + $0xc0] sm:$0xff] }
  0x1f   :  { %495 = vmatpush.msra.mxu3 %v109_v15  ;;  %250 = vmatpush.msra.mxu1 %v109_v15  ;;  %v704_v45 = vld [vmem:[#allocation2 + $0x30] sm:$0xff]  ;;  %v712_v47 = vld [vmem:[#allocation2 + $0x38] sm:$0xff]  ;;  %v720_v49 = vld [vmem:[#allocation2 + $0x40] sm:$0xff] }
  0x20   :  { %480 = vmatpush.msra.mxu2 %v106_v16  ;;  %138 = vmatpush.msra.mxu0 %v106_v16  ;;  %v726_v50 = vld [vmem:[#allocation2 + $0xc8] sm:$0xff]  ;;  %v734_v52 = vld [vmem:[#allocation2 + $0xd0] sm:$0xff]  ;;  %v742_v54 = vld [vmem:[#allocation2 + $0xd8] sm:$0xff] }
  0x21   :  { %496 = vmatpush.msra.mxu3 %v107_v17  ;;  %251 = vmatpush.msra.mxu1 %v107_v17  ;;  %v728_v51 = vld [vmem:[#allocation2 + $0x48] sm:$0xff]  ;;  %v736_v53 = vld [vmem:[#allocation2 + $0x50] sm:$0xff]  ;;  %v744_v55 = vld [vmem:[#allocation2 + $0x58] sm:$0xff] }
  0x22   :  { %481 = vmatpush.msra.mxu2 %v104_v18  ;;  %139 = vmatpush.msra.mxu0 %v104_v18  ;;  %v750_v56 = vld [vmem:[#allocation2 + $0xe0] sm:$0xff]  ;;  %v758_v58 = vld [vmem:[#allocation2 + $0xe8] sm:$0xff]  ;;  %v766_v60 = vld [vmem:[#allocation2 + $0xf0] sm:$0xff] }
  0x23   :  { %497 = vmatpush.msra.mxu3 %v105_v19  ;;  %252 = vmatpush.msra.mxu1 %v105_v19  ;;  %v752_v57 = vld [vmem:[#allocation2 + $0x60] sm:$0xff]  ;;  %v760_v59 = vld [vmem:[#allocation2 + $0x68] sm:$0xff]  ;;  %v768_v61 = vld [vmem:[#allocation2 + $0x70] sm:$0xff] }
  0x24   :  { %482 = vmatpush.msra.mxu2 %v102_v20  ;;  %140 = vmatpush.msra.mxu0 %v102_v20  ;;  %v774_v62 = vld [vmem:[#allocation2 + $0xf8] sm:$0xff]  ;;  %v124_v0 = vld [vmem:[#allocation7] sm:$0x3] }
  0x25   :  { %498 = vmatpush.msra.mxu3 %v103_v21  ;;  %253 = vmatpush.msra.mxu1 %v103_v21  ;;  %v776_v63 = vld [vmem:[#allocation2 + $0x78] sm:$0xff]  ;;  %v782_v1 = vperm.slane %v124_v0, 0  ;;  %v784_v2 = vperm.slane %v124_v0, 1 }
  0x26   :  { %483 = vmatpush.msra.mxu2 %v100_v22  ;;  %141 = vmatpush.msra.mxu0 %v100_v22 }
  0x27   :  { %499 = vmatpush.msra.mxu3 %v101_v23  ;;  %254 = vmatpush.msra.mxu1 %v101_v23 }
  0x28   :  { %484 = vmatpush.msra.mxu2 %v98_v24  ;;  %142 = vmatpush.msra.mxu0 %v98_v24 }
  0x29   :  { %500 = vmatpush.msra.mxu3 %v99_v25  ;;  %255 = vmatpush.msra.mxu1 %v99_v25 }
  0x2a   :  { %485 = vmatpush.msra.mxu2 %v96_v26  ;;  %143 = vmatpush.msra.mxu0 %v96_v26 }
  0x2b   :  { %501 = vmatpush.msra.mxu3 %v97_v27  ;;  %256 = vmatpush.msra.mxu1 %v97_v27 }
  0x2c   :  { %486 = vmatpush.msra.mxu2 %v94_v28  ;;  %144 = vmatpush.msra.mxu0 %v94_v28 }
  0x2d   :  { %502 = vmatpush.msra.mxu3 %v95_v29  ;;  %257 = vmatpush.msra.mxu1 %v95_v29 }
  0x2e   :  { %487 = vmatpush.msra.mxu2 %v92_v30  ;;  %145 = vmatpush.msra.mxu0 %v92_v30 }
  0x2f   :  { %503 = vmatpush.msra.mxu3 %v93_v31  ;;  %194 = vmatmul.f32.vlgmr.msra.gmra.mxu2 %v654_v32 }
  0x30   :  { %307 = vmatmul.f32.vlgmr.msra.gmra.mxu3 %v654_v32  ;;  %258 = vmatpush.msra.mxu1 %v93_v31 }
  0x31   :  { %146 = vmatmul.f32.vlgmr.msra.gmra.mxu0 %v656_v33  ;;  %259 = vmatmul.f32.vlgmr.msra.gmra.mxu1 %v656_v33 }
  0x37   :  { %197 = vmatmul.f32.gmra.mxu2 %v662_v34 }
  0x38   :  { %310 = vmatmul.f32.gmra.mxu3 %v662_v34 }
  0x39   :  { %149 = vmatmul.f32.gmra.mxu0 %v664_v35  ;;  %262 = vmatmul.f32.gmra.mxu1 %v664_v35 }
  0x3f   :  { %200 = vmatmul.f32.gmra.mxu2 %v670_v36 }
  0x40   :  { %313 = vmatmul.f32.gmra.mxu3 %v670_v36 }
  0x41   :  { %152 = vmatmul.f32.gmra.mxu0 %v672_v37  ;;  %265 = vmatmul.f32.gmra.mxu1 %v672_v37 }
  0x47   :  { %203 = vmatmul.f32.gmra.mxu2 %v678_v38 }
  0x48   :  { %316 = vmatmul.f32.gmra.mxu3 %v678_v38 }
  0x49   :  { %155 = vmatmul.f32.gmra.mxu0 %v680_v39  ;;  %268 = vmatmul.f32.gmra.mxu1 %v680_v39 }
  0x4f   :  { %206 = vmatmul.f32.gmra.mxu2 %v686_v40 }
  0x50   :  { %319 = vmatmul.f32.gmra.mxu3 %v686_v40 }
  0x51   :  { %158 = vmatmul.f32.gmra.mxu0 %v688_v41  ;;  %271 = vmatmul.f32.gmra.mxu1 %v688_v41 }
  0x57   :  { %209 = vmatmul.f32.gmra.mxu2 %v694_v42 }
  0x58   :  { %322 = vmatmul.f32.gmra.mxu3 %v694_v42 }
  0x59   :  { %161 = vmatmul.f32.gmra.mxu0 %v696_v43  ;;  %274 = vmatmul.f32.gmra.mxu1 %v696_v43 }
  0x5f   :  { %212 = vmatmul.f32.gmra.mxu2 %v702_v44 }
  0x60   :  { %325 = vmatmul.f32.gmra.mxu3 %v702_v44 }
  0x61   :  { %164 = vmatmul.f32.gmra.mxu0 %v704_v45  ;;  %277 = vmatmul.f32.gmra.mxu1 %v704_v45 }
  0x67   :  { %215 = vmatmul.f32.gmra.mxu2 %v710_v46 }
  0x68   :  { %328 = vmatmul.f32.gmra.mxu3 %v710_v46 }
  0x69   :  { %167 = vmatmul.f32.gmra.mxu0 %v712_v47  ;;  %280 = vmatmul.f32.gmra.mxu1 %v712_v47 }
  0x6f   :  { %218 = vmatmul.f32.gmra.mxu2 %v718_v48 }
  0x70   :  { %331 = vmatmul.f32.gmra.mxu3 %v718_v48 }
  0x71   :  { %170 = vmatmul.f32.gmra.mxu0 %v720_v49  ;;  %283 = vmatmul.f32.gmra.mxu1 %v720_v49 }
  0x77   :  { %221 = vmatmul.f32.gmra.mxu2 %v726_v50 }
  0x78   :  { %334 = vmatmul.f32.gmra.mxu3 %v726_v50 }
  0x79   :  { %173 = vmatmul.f32.gmra.mxu0 %v728_v51  ;;  %286 = vmatmul.f32.gmra.mxu1 %v728_v51 }
  0x7f   :  { %224 = vmatmul.f32.gmra.mxu2 %v734_v52 }
  0x80   :  { %337 = vmatmul.f32.gmra.mxu3 %v734_v52 }
  0x81   :  { %176 = vmatmul.f32.gmra.mxu0 %v736_v53  ;;  %289 = vmatmul.f32.gmra.mxu1 %v736_v53 }
  0x87   :  { %227 = vmatmul.f32.gmra.mxu2 %v742_v54 }
  0x88   :  { %340 = vmatmul.f32.gmra.mxu3 %v742_v54 }
  0x89   :  { %179 = vmatmul.f32.gmra.mxu0 %v744_v55  ;;  %292 = vmatmul.f32.gmra.mxu1 %v744_v55 }
  0x8f   :  { %230 = vmatmul.f32.gmra.mxu2 %v750_v56 }
  0x90   :  { %343 = vmatmul.f32.gmra.mxu3 %v750_v56 }
  0x91   :  { %182 = vmatmul.f32.gmra.mxu0 %v752_v57  ;;  %295 = vmatmul.f32.gmra.mxu1 %v752_v57 }
  0x97   :  { %233 = vmatmul.f32.gmra.mxu2 %v758_v58 }
  0x98   :  { %346 = vmatmul.f32.gmra.mxu3 %v758_v58 }
  0x99   :  { %185 = vmatmul.f32.gmra.mxu0 %v760_v59  ;;  %298 = vmatmul.f32.gmra.mxu1 %v760_v59 }
  0x9f   :  { %236 = vmatmul.f32.gmra.mxu2 %v766_v60 }
  0xa0   :  { %349 = vmatmul.f32.gmra.mxu3 %v766_v60 }
  0xa1   :  { %188 = vmatmul.f32.gmra.mxu0 %v768_v61  ;;  %301 = vmatmul.f32.gmra.mxu1 %v768_v61 }
  0xa7   :  { %239 = vmatmul.f32.gmra.mxu2 %v774_v62 }
  0xa8   :  { %352 = vmatmul.f32.gmra.mxu3 %v774_v62 }
  0xa9   :  { %191 = vmatmul.f32.gmra.mxu0 %v776_v63  ;;  %304 = vmatmul.f32.gmra.mxu1 %v776_v63 }
  0xae   :  { %v147_v3 = vpop.f32.mrf.mxu0  ;;  %v260_v4 = vpop.f32.mrf.mxu1 }
  0xaf   :  { %v148_v5 = vadd.f32 %v147_v3, %v782_v1  ;;  %v261_v6 = vadd.f32 %v260_v4, %v784_v2 }
  0xb1   :  { %v356_v7 = vadd.f32 %v148_v5, %v656_v33  ;;  %420 = vst [vmem:[#allocation8 + $0x8] sm:$0xff] %v261_v6 }
  0xb2   :  { %v195_v8 = vpop.f32.mrf.mxu2 }
  0xb3   :  { %v308_v9 = vpop.f32.mrf.mxu3  ;;  %388 = vst [vmem:[#allocation8] sm:$0xff] %v356_v7  ;;  %v196_v10 = vadd.f32 %v195_v8, %v782_v1 }
  0xb4   :  { %v309_v11 = vadd.f32 %v308_v9, %v784_v2 }
  0xb5   :  { %v372_v12 = vadd.f32 %v196_v10, %v654_v32 }
  0xb6   :  { %436 = vst [vmem:[#allocation8 + $0x108] sm:$0xff] %v309_v11  ;;  %v150_v13 = vpop.f32.mrf.mxu0  ;;  %v263_v14 = vpop.f32.mrf.mxu1 }
  0xb7   :  { %404 = vst [vmem:[#allocation8 + $0x100] sm:$0xff] %v372_v12  ;;  %v151_v15 = vadd.f32 %v150_v13, %v782_v1  ;;  %v264_v16 = vadd.f32 %v263_v14, %v784_v2 }
  0xb9   :  { %v357_v17 = vadd.f32 %v151_v15, %v664_v35  ;;  %421 = vst [vmem:[#allocation8 + $0x18] sm:$0xff] %v264_v16 }
  0xba   :  { %v198_v18 = vpop.f32.mrf.mxu2 }
  0xbb   :  { %v311_v19 = vpop.f32.mrf.mxu3  ;;  %389 = vst [vmem:[#allocation8 + $0x10] sm:$0xff] %v357_v17  ;;  %v199_v20 = vadd.f32 %v198_v18, %v782_v1 }
  0xbc   :  { %v312_v21 = vadd.f32 %v311_v19, %v784_v2 }
  0xbd   :  { %v373_v22 = vadd.f32 %v199_v20, %v662_v34 }
  0xbe   :  { %437 = vst [vmem:[#allocation8 + $0x118] sm:$0xff] %v312_v21  ;;  %v153_v23 = vpop.f32.mrf.mxu0  ;;  %v266_v24 = vpop.f32.mrf.mxu1 }
  0xbf   :  { %405 = vst [vmem:[#allocation8 + $0x110] sm:$0xff] %v373_v22  ;;  %v154_v25 = vadd.f32 %v153_v23, %v782_v1  ;;  %v267_v26 = vadd.f32 %v266_v24, %v784_v2 }
  0xc1   :  { %v358_v27 = vadd.f32 %v154_v25, %v672_v37  ;;  %422 = vst [vmem:[#allocation8 + $0x28] sm:$0xff] %v267_v26 }
  0xc2   :  { %v201_v28 = vpop.f32.mrf.mxu2 }
  0xc3   :  { %v314_v29 = vpop.f32.mrf.mxu3  ;;  %390 = vst [vmem:[#allocation8 + $0x20] sm:$0xff] %v358_v27  ;;  %v202_v30 = vadd.f32 %v201_v28, %v782_v1 }
  0xc4   :  { %v315_v31 = vadd.f32 %v314_v29, %v784_v2 }
  0xc5   :  { %v374_v32 = vadd.f32 %v202_v30, %v670_v36 }
  0xc6   :  { %438 = vst [vmem:[#allocation8 + $0x128] sm:$0xff] %v315_v31  ;;  %v156_v33 = vpop.f32.mrf.mxu0  ;;  %v269_v34 = vpop.f32.mrf.mxu1 }
  0xc7   :  { %406 = vst [vmem:[#allocation8 + $0x120] sm:$0xff] %v374_v32  ;;  %v157_v35 = vadd.f32 %v156_v33, %v782_v1  ;;  %v270_v0 = vadd.f32 %v269_v34, %v784_v2 }
  0xc9   :  { %v359_v37 = vadd.f32 %v157_v35, %v680_v39  ;;  %423 = vst [vmem:[#allocation8 + $0x38] sm:$0xff] %v270_v0 }
  0xca   :  { %v204_v3 = vpop.f32.mrf.mxu2 }
  0xcb   :  { %v317_v4 = vpop.f32.mrf.mxu3  ;;  %391 = vst [vmem:[#allocation8 + $0x30] sm:$0xff] %v359_v37  ;;  %v205_v5 = vadd.f32 %v204_v3, %v782_v1 }
  0xcc   :  { %v318_v6 = vadd.f32 %v317_v4, %v784_v2 }
  0xcd   :  { %v375_v36 = vadd.f32 %v205_v5, %v678_v38 }
  0xce   :  { %439 = vst [vmem:[#allocation8 + $0x138] sm:$0xff] %v318_v6  ;;  %v159_v7 = vpop.f32.mrf.mxu0  ;;  %v272_v8 = vpop.f32.mrf.mxu1 }
  0xcf   :  { %407 = vst [vmem:[#allocation8 + $0x130] sm:$0xff] %v375_v36  ;;  %v160_v9 = vadd.f32 %v159_v7, %v782_v1  ;;  %v273_v10 = vadd.f32 %v272_v8, %v784_v2 }
  0xd1   :  { %v360_v39 = vadd.f32 %v160_v9, %v688_v41  ;;  %424 = vst [vmem:[#allocation8 + $0x48] sm:$0xff] %v273_v10 }
  0xd2   :  { %v207_v11 = vpop.f32.mrf.mxu2 }
  0xd3   :  { %v320_v12 = vpop.f32.mrf.mxu3  ;;  %392 = vst [vmem:[#allocation8 + $0x40] sm:$0xff] %v360_v39  ;;  %v208_v13 = vadd.f32 %v207_v11, %v782_v1 }
  0xd4   :  { %v321_v14 = vadd.f32 %v320_v12, %v784_v2 }
  0xd5   :  { %v376_v38 = vadd.f32 %v208_v13, %v686_v40 }
  0xd6   :  { %440 = vst [vmem:[#allocation8 + $0x148] sm:$0xff] %v321_v14  ;;  %v162_v15 = vpop.f32.mrf.mxu0  ;;  %v275_v16 = vpop.f32.mrf.mxu1 }
  0xd7   :  { %408 = vst [vmem:[#allocation8 + $0x140] sm:$0xff] %v376_v38  ;;  %v163_v17 = vadd.f32 %v162_v15, %v782_v1  ;;  %v276_v18 = vadd.f32 %v275_v16, %v784_v2 }
  0xd9   :  { %v361_v41 = vadd.f32 %v163_v17, %v696_v43  ;;  %425 = vst [vmem:[#allocation8 + $0x58] sm:$0xff] %v276_v18 }
  0xda   :  { %v210_v19 = vpop.f32.mrf.mxu2 }
  0xdb   :  { %v323_v20 = vpop.f32.mrf.mxu3  ;;  %393 = vst [vmem:[#allocation8 + $0x50] sm:$0xff] %v361_v41  ;;  %v211_v21 = vadd.f32 %v210_v19, %v782_v1 }
  0xdc   :  { %v324_v22 = vadd.f32 %v323_v20, %v784_v2 }
  0xdd   :  { %v377_v40 = vadd.f32 %v211_v21, %v694_v42 }
  0xde   :  { %441 = vst [vmem:[#allocation8 + $0x158] sm:$0xff] %v324_v22  ;;  %v165_v23 = vpop.f32.mrf.mxu0  ;;  %v278_v24 = vpop.f32.mrf.mxu1 }
  0xdf   :  { %409 = vst [vmem:[#allocation8 + $0x150] sm:$0xff] %v377_v40  ;;  %v166_v25 = vadd.f32 %v165_v23, %v782_v1  ;;  %v279_v26 = vadd.f32 %v278_v24, %v784_v2 }
  0xe1   :  { %v362_v43 = vadd.f32 %v166_v25, %v704_v45  ;;  %426 = vst [vmem:[#allocation8 + $0x68] sm:$0xff] %v279_v26 }
  0xe2   :  { %v213_v27 = vpop.f32.mrf.mxu2 }
  0xe3   :  { %v326_v28 = vpop.f32.mrf.mxu3  ;;  %394 = vst [vmem:[#allocation8 + $0x60] sm:$0xff] %v362_v43  ;;  %v214_v29 = vadd.f32 %v213_v27, %v782_v1 }
  0xe4   :  { %v327_v30 = vadd.f32 %v326_v28, %v784_v2 }
  0xe5   :  { %v378_v42 = vadd.f32 %v214_v29, %v702_v44 }
  0xe6   :  { %442 = vst [vmem:[#allocation8 + $0x168] sm:$0xff] %v327_v30  ;;  %v168_v31 = vpop.f32.mrf.mxu0  ;;  %v281_v32 = vpop.f32.mrf.mxu1 }
  0xe7   :  { %410 = vst [vmem:[#allocation8 + $0x160] sm:$0xff] %v378_v42  ;;  %v169_v33 = vadd.f32 %v168_v31, %v782_v1  ;;  %v282_v34 = vadd.f32 %v281_v32, %v784_v2 }
  0xe9   :  { %v363_v45 = vadd.f32 %v169_v33, %v712_v47  ;;  %427 = vst [vmem:[#allocation8 + $0x78] sm:$0xff] %v282_v34 }
  0xea   :  { %v216_v35 = vpop.f32.mrf.mxu2 }
  0xeb   :  { %v329_v0 = vpop.f32.mrf.mxu3  ;;  %395 = vst [vmem:[#allocation8 + $0x70] sm:$0xff] %v363_v45  ;;  %v217_v37 = vadd.f32 %v216_v35, %v782_v1 }
  0xec   :  { %v330_v3 = vadd.f32 %v329_v0, %v784_v2 }
  0xed   :  { %v379_v44 = vadd.f32 %v217_v37, %v710_v46 }
  0xee   :  { %443 = vst [vmem:[#allocation8 + $0x178] sm:$0xff] %v330_v3  ;;  %v171_v4 = vpop.f32.mrf.mxu0  ;;  %v284_v5 = vpop.f32.mrf.mxu1 }
  0xef   :  { %411 = vst [vmem:[#allocation8 + $0x170] sm:$0xff] %v379_v44  ;;  %v172_v6 = vadd.f32 %v171_v4, %v782_v1  ;;  %v285_v36 = vadd.f32 %v284_v5, %v784_v2 }
  0xf1   :  { %v364_v47 = vadd.f32 %v172_v6, %v720_v49  ;;  %428 = vst [vmem:[#allocation8 + $0x88] sm:$0xff] %v285_v36 }
  0xf2   :  { %v219_v7 = vpop.f32.mrf.mxu2 }
  0xf3   :  { %v332_v8 = vpop.f32.mrf.mxu3  ;;  %396 = vst [vmem:[#allocation8 + $0x80] sm:$0xff] %v364_v47  ;;  %v220_v9 = vadd.f32 %v219_v7, %v782_v1 }
  0xf4   :  { %v333_v10 = vadd.f32 %v332_v8, %v784_v2 }
  0xf5   :  { %v380_v46 = vadd.f32 %v220_v9, %v718_v48 }
  0xf6   :  { %444 = vst [vmem:[#allocation8 + $0x188] sm:$0xff] %v333_v10  ;;  %v174_v39 = vpop.f32.mrf.mxu0  ;;  %v287_v11 = vpop.f32.mrf.mxu1 }
  0xf7   :  { %412 = vst [vmem:[#allocation8 + $0x180] sm:$0xff] %v380_v46  ;;  %v175_v12 = vadd.f32 %v174_v39, %v782_v1  ;;  %v288_v13 = vadd.f32 %v287_v11, %v784_v2 }
  0xf9   :  { %v365_v49 = vadd.f32 %v175_v12, %v728_v51  ;;  %429 = vst [vmem:[#allocation8 + $0x98] sm:$0xff] %v288_v13 }
  0xfa   :  { %v222_v14 = vpop.f32.mrf.mxu2 }
  0xfb   :  { %v335_v38 = vpop.f32.mrf.mxu3  ;;  %397 = vst [vmem:[#allocation8 + $0x90] sm:$0xff] %v365_v49  ;;  %v223_v15 = vadd.f32 %v222_v14, %v782_v1 }
  0xfc   :  { %v336_v16 = vadd.f32 %v335_v38, %v784_v2 }
  0xfd   :  { %v381_v48 = vadd.f32 %v223_v15, %v726_v50 }
  0xfe   :  { %445 = vst [vmem:[#allocation8 + $0x198] sm:$0xff] %v336_v16  ;;  %v177_v17 = vpop.f32.mrf.mxu0  ;;  %v290_v18 = vpop.f32.mrf.mxu1 }
  0xff   :  { %413 = vst [vmem:[#allocation8 + $0x190] sm:$0xff] %v381_v48  ;;  %v178_v41 = vadd.f32 %v177_v17, %v782_v1  ;;  %v291_v19 = vadd.f32 %v290_v18, %v784_v2 }
 0x101   :  { %v366_v51 = vadd.f32 %v178_v41, %v736_v53  ;;  %430 = vst [vmem:[#allocation8 + $0xa8] sm:$0xff] %v291_v19 }
 0x102   :  { %v225_v20 = vpop.f32.mrf.mxu2 }
 0x103   :  { %v338_v21 = vpop.f32.mrf.mxu3  ;;  %398 = vst [vmem:[#allocation8 + $0xa0] sm:$0xff] %v366_v51  ;;  %v226_v22 = vadd.f32 %v225_v20, %v782_v1 }
 0x104   :  { %v339_v40 = vadd.f32 %v338_v21, %v784_v2 }
 0x105   :  { %v382_v50 = vadd.f32 %v226_v22, %v734_v52 }
 0x106   :  { %446 = vst [vmem:[#allocation8 + $0x1a8] sm:$0xff] %v339_v40  ;;  %v180_v23 = vpop.f32.mrf.mxu0  ;;  %v293_v24 = vpop.f32.mrf.mxu1 }
 0x107   :  { %414 = vst [vmem:[#allocation8 + $0x1a0] sm:$0xff] %v382_v50  ;;  %v181_v25 = vadd.f32 %v180_v23, %v782_v1  ;;  %v294_v26 = vadd.f32 %v293_v24, %v784_v2 }
 0x109   :  { %v367_v53 = vadd.f32 %v181_v25, %v744_v55  ;;  %431 = vst [vmem:[#allocation8 + $0xb8] sm:$0xff] %v294_v26 }
 0x10a   :  { %v228_v43 = vpop.f32.mrf.mxu2 }
 0x10b   :  { %v341_v27 = vpop.f32.mrf.mxu3  ;;  %399 = vst [vmem:[#allocation8 + $0xb0] sm:$0xff] %v367_v53  ;;  %v229_v28 = vadd.f32 %v228_v43, %v782_v1 }
 0x10c   :  { %v342_v29 = vadd.f32 %v341_v27, %v784_v2 }
 0x10d   :  { %v383_v52 = vadd.f32 %v229_v28, %v742_v54 }
 0x10e   :  { %447 = vst [vmem:[#allocation8 + $0x1b8] sm:$0xff] %v342_v29  ;;  %v183_v30 = vpop.f32.mrf.mxu0  ;;  %v296_v42 = vpop.f32.mrf.mxu1 }
 0x10f   :  { %415 = vst [vmem:[#allocation8 + $0x1b0] sm:$0xff] %v383_v52  ;;  %v184_v31 = vadd.f32 %v183_v30, %v782_v1  ;;  %v297_v32 = vadd.f32 %v296_v42, %v784_v2 }
 0x111   :  { %v368_v55 = vadd.f32 %v184_v31, %v752_v57  ;;  %432 = vst [vmem:[#allocation8 + $0xc8] sm:$0xff] %v297_v32 }
 0x112   :  { %v231_v33 = vpop.f32.mrf.mxu2 }
 0x113   :  { %v344_v34 = vpop.f32.mrf.mxu3  ;;  %400 = vst [vmem:[#allocation8 + $0xc0] sm:$0xff] %v368_v55  ;;  %v232_v45 = vadd.f32 %v231_v33, %v782_v1 }
 0x114   :  { %v345_v35 = vadd.f32 %v344_v34, %v784_v2 }
 0x115   :  { %v384_v54 = vadd.f32 %v232_v45, %v750_v56 }
 0x116   :  { %448 = vst [vmem:[#allocation8 + $0x1c8] sm:$0xff] %v345_v35  ;;  %v186_v0 = vpop.f32.mrf.mxu0  ;;  %v299_v37 = vpop.f32.mrf.mxu1 }
 0x117   :  { %416 = vst [vmem:[#allocation8 + $0x1c0] sm:$0xff] %v384_v54  ;;  %v187_v3 = vadd.f32 %v186_v0, %v782_v1  ;;  %v300_v44 = vadd.f32 %v299_v37, %v784_v2 }
 0x119   :  { %v369_v57 = vadd.f32 %v187_v3, %v760_v59  ;;  %433 = vst [vmem:[#allocation8 + $0xd8] sm:$0xff] %v300_v44 }
 0x11a   :  { %v234_v4 = vpop.f32.mrf.mxu2 }
 0x11b   :  { %v347_v5 = vpop.f32.mrf.mxu3  ;;  %401 = vst [vmem:[#allocation8 + $0xd0] sm:$0xff] %v369_v57  ;;  %v235_v6 = vadd.f32 %v234_v4, %v782_v1 }
 0x11c   :  { %v348_v36 = vadd.f32 %v347_v5, %v784_v2 }
 0x11d   :  { %v385_v56 = vadd.f32 %v235_v6, %v758_v58 }
 0x11e   :  { %449 = vst [vmem:[#allocation8 + $0x1d8] sm:$0xff] %v348_v36  ;;  %v189_v47 = vpop.f32.mrf.mxu0  ;;  %v302_v7 = vpop.f32.mrf.mxu1 }
 0x11f   :  { %417 = vst [vmem:[#allocation8 + $0x1d0] sm:$0xff] %v385_v56  ;;  %v190_v8 = vadd.f32 %v189_v47, %v782_v1  ;;  %v303_v9 = vadd.f32 %v302_v7, %v784_v2 }
 0x121   :  { %v370_v59 = vadd.f32 %v190_v8, %v768_v61  ;;  %434 = vst [vmem:[#allocation8 + $0xe8] sm:$0xff] %v303_v9 }
 0x122   :  { %v237_v10 = vpop.f32.mrf.mxu2 }
 0x123   :  { %v350_v46 = vpop.f32.mrf.mxu3  ;;  %402 = vst [vmem:[#allocation8 + $0xe0] sm:$0xff] %v370_v59  ;;  %v238_v39 = vadd.f32 %v237_v10, %v782_v1 }
 0x124   :  { %v351_v11 = vadd.f32 %v350_v46, %v784_v2 }
 0x125   :  { %v386_v58 = vadd.f32 %v238_v39, %v766_v60 }
 0x126   :  { %450 = vst [vmem:[#allocation8 + $0x1e8] sm:$0xff] %v351_v11  ;;  %v192_v12 = vpop.f32.mrf.mxu0  ;;  %v305_v13 = vpop.f32.mrf.mxu1 }
 0x127   :  { %418 = vst [vmem:[#allocation8 + $0x1e0] sm:$0xff] %v386_v58  ;;  %v193_v49 = vadd.f32 %v192_v12, %v782_v1  ;;  %v306_v14 = vadd.f32 %v305_v13, %v784_v2 }
 0x129   :  { %v371_v61 = vadd.f32 %v193_v49, %v776_v63  ;;  %435 = vst [vmem:[#allocation8 + $0xf8] sm:$0xff] %v306_v14 }
 0x12a   :  { %v240_v38 = vpop.f32.mrf.mxu2 }
 0x12b   :  { %v353_v15 = vpop.f32.mrf.mxu3  ;;  %403 = vst [vmem:[#allocation8 + $0xf0] sm:$0xff] %v371_v61  ;;  %v241_v60 = vadd.f32 %v240_v38, %v782_v1 }
 0x12c   :  { %v354_v16 = vadd.f32 %v353_v15, %v784_v2 }
 0x12d   :  { %v387_v48 = vadd.f32 %v241_v60, %v774_v62 }
 0x12e   :  { %451 = vst [vmem:[#allocation8 + $0x1f8] sm:$0xff] %v354_v16 }
 0x12f   :  { %419 = vst [vmem:[#allocation8 + $0x1f0] sm:$0xff] %v387_v48 }
 0x130   :  { %464 = dma.vmem_to_hbm [thread:$0]  %s457_s29, 8192, %s459_s5, [#allocation4], %s615_s20, %s615_s20, %s616_s21  }
 0x131   :  { %612 = dma.done.wait [#allocation4], 8192  }
 0x132   :  { %613 = vsyncadd [#allocation4], 4294959104 }
 0x133   :  { %469 = vsyncpa [#allocation3], 1 }
 0x134   :  { %470 = vsyncpa [#allocation6], 1 }
 0x135   :  { %471 = vsyncpa [#allocation4], 1 }

</bundles_post_ra>
